<compile_context>
chip_gen: v7x
topology: tpu7x:2x2x1
jax: 0.10.0
libtpu: 0.0.40
codegen_flags: <defaults>
</compile_context>

<pallas_src>
import functools

import jax
import jax.numpy as jnp
import numpy as np
from jax.experimental import pallas as pl
from jax.experimental.pallas import tpu as pltpu


def attention_kernel(x_ref, wqkvT_ref, bqkv_ref, ones_ref, wfcT_ref, bfc_ref,
                     out_ref, *, hid_dim, head_dim):
    tb = x_ref.shape[0]

    # ---- fused Q/K/V projection: one (TB, 3HD) @ (3HD, 3HD) MXU matmul ----
    qkv = (jnp.dot(x_ref[...], wqkvT_ref[...], preferred_element_type=jnp.float32)
           + bqkv_ref[...])
    q = qkv[:, :hid_dim]                       # 1/sqrt(head_dim) already folded in
    k = qkv[:, hid_dim:2 * hid_dim]
    v = qkv[:, 2 * hid_dim:]

    # ---- per-head gather as (mask * x) @ block-diag-ones (bf16 MXU), lane dense ----
    within = jax.lax.broadcasted_iota(jnp.int32, (tb, hid_dim), 1) % head_dim
    ones_bd = ones_ref[...]                    # (HD, HD) bf16 0/1 block-diagonal

    def gather_d(x, d):
        # out[b, i] = x[b, head(i)*head_dim + d]
        xm = jnp.where(within == d, x, 0.0).astype(jnp.bfloat16)
        return jnp.dot(xm, ones_bd, preferred_element_type=jnp.float32)

    def loop(body, init):
        if head_dim <= 16:                     # tiny head_dim: full static unroll
            carry = init
            for d in range(head_dim):
                carry = body(d, carry)
            return carry
        # large head_dim: bound live ranges / vreg pressure with a real loop
        return jax.lax.fori_loop(0, head_dim, body, init, unroll=8)

    # ---- pass 1: per-head kmax/kmin -> exact row max of the energies ----
    def minmax_body(d, carry):
        kmax, kmin = carry
        k_d = gather_d(k, d)
        return jnp.maximum(kmax, k_d), jnp.minimum(kmin, k_d)

    kmax, kmin = loop(minmax_body,
                      (jnp.full((tb, hid_dim), -jnp.inf, jnp.float32),
                       jnp.full((tb, hid_dim), jnp.inf, jnp.float32)))
    m = jnp.where(q >= 0.0, q * kmax, q * kmin)        # == max_j q * k_j (exact)

    # ---- pass 2: single-exp softmax accumulation (no serial rescale chain) ----
    def acc_body(d, carry):
        l, acc = carry
        k_d = gather_d(k, d)
        v_d = gather_d(v, d)
        p = jnp.exp(q * k_d - m)
        return l + p, acc + p * v_d

    l, acc = loop(acc_body, (jnp.zeros((tb, hid_dim), jnp.float32),
                             jnp.zeros((tb, hid_dim), jnp.float32)))
    wm = acc * pl.reciprocal(l, approx=False)          # exact normalization (EUP)

    # ---- final fc; the permute(0,2,1,3).view interleave is folded into wfcT ----
    out = jnp.dot(wm, wfcT_ref[...], preferred_element_type=jnp.float32) + bfc_ref[...]
    out_ref[...] = out.astype(out_ref.dtype)


def attention_block(query, key, value, params, *, n_heads, block_b=1024):
    B, hid_dim = query.shape
    assert hid_dim % n_heads == 0
    head_dim = hid_dim // n_heads
    inv_scale = 1.0 / float(np.sqrt(head_dim))
    f32 = jnp.float32

    # -------- constant / layout-only prep (weights & biases) --------
    wqT = params["wq"].T.astype(f32) * inv_scale       # fold 1/sqrt(D) into Wq, bq
    wkT = params["wk"].T.astype(f32)
    wvT = params["wv"].T.astype(f32)
    # fused QKV projection: [query|key|value] @ blockdiag(WqT, WkT, WvT) = [Q|K|V]
    wqkvT = jax.scipy.linalg.block_diag(wqT, wkT, wvT)             # (3HD, 3HD)
    bqkv = jnp.concatenate([params["bq"] * inv_scale, params["bk"],
                            params["bv"]]).reshape(1, 3 * hid_dim).astype(f32)
    # fc consumes the torch interleave c = d*H + h; the kernel emits m = h*D + d.
    wfcT = jnp.transpose(params["wfc"].reshape(hid_dim, head_dim, n_heads),
                         (2, 1, 0)).reshape(hid_dim, hid_dim).astype(f32)
    bfc = params["bfc"].reshape(1, hid_dim).astype(f32)
    # (HD, HD) block-diag ones: broadcasts a masked per-head element across its head.
    ones_bd = jnp.asarray(np.kron(np.eye(n_heads, dtype=np.float32),
                                  np.ones((head_dim, head_dim), np.float32)),
                          dtype=jnp.bfloat16)

    # -------- batch tiling --------
    if B <= 8:
        tb = B                                  # single sublane-tile step
    else:
        # >=2 grid steps so the "parallel" batch axis shards across v7x's 2 TCs;
        # block_b caps the tile (raise on v5e, re-check VMEM before raising on v7x).
        half = (B + 1) // 2
        tb = min(block_b, ((half + 7) // 8) * 8)
    bp = -(-B // tb) * tb
    grid = (bp // tb,)

    # lane-concat of the three activation streams (layout plumbing only).
    x = jnp.concatenate([query, key, value], axis=1).astype(f32)
    if bp != B:
        x = jnp.pad(x, ((0, bp - B), (0, 0)))

    kernel = functools.partial(attention_kernel, hid_dim=hid_dim, head_dim=head_dim)
    x_spec = pl.BlockSpec((tb, 3 * hid_dim), lambda i: (i, 0))
    out_spec = pl.BlockSpec((tb, hid_dim), lambda i: (i, 0))

    def run(single_buffer_consts):
        ckw = {"pipeline_mode": pl.Buffered(1)} if single_buffer_consts else {}

        def cspec(shape):
            return pl.BlockSpec(shape, lambda i: (0,) * len(shape), **ckw)

        return pl.pallas_call(
            kernel,
            out_shape=jax.ShapeDtypeStruct((bp, hid_dim), f32),
            grid=grid,
            in_specs=[x_spec,
                      cspec((3 * hid_dim, 3 * hid_dim)),   # fused block-diag QKV weight
                      cspec((1, 3 * hid_dim)),             # fused QKV bias
                      cspec((hid_dim, hid_dim)),           # block-diag ones (bf16)
                      cspec((hid_dim, hid_dim)),           # fc weight (re-ordered)
                      cspec((1, hid_dim))],                # fc bias
            out_specs=out_spec,
            compiler_params=pltpu.CompilerParams(
                dimension_semantics=("parallel",),
                vmem_limit_bytes=48 * 1024 * 1024),
        )(x, wqkvT, bqkv, ones_bd, wfcT, bfc)

    try:
        # Constants never change across the grid -> single-buffer them.
        out = jax.block_until_ready(run(True))
    except Exception:
        # Fallback for JAX builds that reject pipeline_mode=pl.Buffered(1):
        # identical math, default double-buffered constants.
        out = run(False)

    return out[:B]                                         # drop padded rows (if any)


def reference(query, key, value, params, *, n_heads):
    """Pure-JAX transcription of the PyTorch forward (eval mode, mask=None)."""
    B, hid_dim = query.shape
    head_dim = hid_dim // n_heads
    scale = jnp.sqrt(jnp.float32(head_dim))
    Q = query @ params["wq"].T + params["bq"]
    K = key @ params["wk"].T + params["bk"]
    V = value @ params["wv"].T + params["bv"]
    Qh = Q.reshape(B, n_heads, head_dim)[..., None]            # (B,H,D,1)
    Kt = K.reshape(B, n_heads, head_dim)[:, :, None, :]        # (B,H,1,D)
    Vh = V.reshape(B, n_heads, head_dim)[..., None]            # (B,H,D,1)
    energy = jnp.matmul(Qh, Kt) / scale                        # (B,H,D,D)
    attn = jax.nn.softmax(energy, axis=-1)
    wm = jnp.matmul(attn, Vh)                                  # (B,H,D,1)
    wm = jnp.transpose(wm, (0, 2, 1, 3)).reshape(B, hid_dim)   # permute + view
    return wm @ params["wfc"].T + params["bfc"]


if __name__ == "__main__":
    B, hid_dim, n_heads = 4, 32, 4      # head_dim = 8, dropout = 0.1 (eval -> identity)

    root = jax.random.PRNGKey(0)
    ks = jax.random.split(root, 11)
    init = lambda k, shape: jax.random.normal(k, shape, jnp.float32) * 0.1
    params = {
        "wq": init(ks[0], (hid_dim, hid_dim)), "bq": init(ks[1], (hid_dim,)),
        "wk": init(ks[2], (hid_dim, hid_dim)), "bk": init(ks[3], (hid_dim,)),
        "wv": init(ks[4], (hid_dim, hid_dim)), "bv": init(ks[5], (hid_dim,)),
        "wfc": init(ks[6], (hid_dim, hid_dim)), "bfc": init(ks[7], (hid_dim,)),
    }
    query = jax.random.normal(ks[8], (B, hid_dim), jnp.float32)
    key_in = jax.random.normal(ks[9], (B, hid_dim), jnp.float32)
    value = jax.random.normal(ks[10], (B, hid_dim), jnp.float32)

    out = attention_block(query, key_in, value, params, n_heads=n_heads)
    out = jax.block_until_ready(out)

    ref = reference(query, key_in, value, params, n_heads=n_heads)
    np.testing.assert_allclose(np.asarray(out), np.asarray(ref), rtol=5e-3, atol=5e-3)
    print("KERNEL_OK")
</pallas_src>

<mosaic_0001>
module attributes {stable_mosaic.version = 11 : i64} {
  func.func @attention_kernel(%arg0: i32, %arg1: memref<4x96xf32, #tpu.memory_space<vmem>>, %arg2: memref<96x96xf32, #tpu.memory_space<vmem>>, %arg3: memref<1x96xf32, #tpu.memory_space<vmem>>, %arg4: memref<32x32xbf16, #tpu.memory_space<vmem>>, %arg5: memref<32x32xf32, #tpu.memory_space<vmem>>, %arg6: memref<1x32xf32, #tpu.memory_space<vmem>>, %arg7: memref<4x32xf32, #tpu.memory_space<vmem>>) attributes {dimension_semantics = [#tpu.dimension_semantics<parallel>], iteration_bounds = array<i64: 1>, scalar_prefetch = 0 : i64, scratch_operands = 0 : i64, tpu.core_type = #tpu.core_type<tc>, window_params = [{transform_indices = @transform_0, window_bounds = array<i64: 4, 96>}, {pipeline_mode = #tpu.pipeline_mode<synchronous>, transform_indices = @transform_1, window_bounds = array<i64: 96, 96>}, {pipeline_mode = #tpu.pipeline_mode<synchronous>, transform_indices = @transform_2, window_bounds = array<i64: 1, 96>}, {pipeline_mode = #tpu.pipeline_mode<synchronous>, transform_indices = @transform_3, window_bounds = array<i64: 32, 32>}, {pipeline_mode = #tpu.pipeline_mode<synchronous>, transform_indices = @transform_4, window_bounds = array<i64: 32, 32>}, {pipeline_mode = #tpu.pipeline_mode<synchronous>, transform_indices = @transform_5, window_bounds = array<i64: 1, 32>}, {transform_indices = @transform_6, window_bounds = array<i64: 4, 32>}]} {
    %c0 = arith.constant 0 : index
    %c0_0 = arith.constant 0 : index
    %0 = vector.load %arg1[%c0, %c0_0] : memref<4x96xf32, #tpu.memory_space<vmem>>, vector<4x96xf32>
    %c0_1 = arith.constant 0 : index
    %c0_2 = arith.constant 0 : index
    %1 = vector.load %arg2[%c0_1, %c0_2] : memref<96x96xf32, #tpu.memory_space<vmem>>, vector<96x96xf32>
    %cst = arith.constant dense<0.000000e+00> : vector<4x96xf32>
    %2 = tpu.matmul %0, %1, %cst {dimension_numbers = #tpu.dot_dimension_numbers<[1], [0], [0], [1], [0, 0, 1, 1], [], []>} : vector<4x96xf32>, vector<96x96xf32>, vector<4x96xf32> -> vector<4x96xf32>
    %c0_3 = arith.constant 0 : index
    %c0_4 = arith.constant 0 : index
    %3 = vector.load %arg3[%c0_3, %c0_4] : memref<1x96xf32, #tpu.memory_space<vmem>>, vector<1x96xf32>
    %4 = vector.broadcast %3 : vector<1x96xf32> to vector<4x96xf32>
    %5 = arith.addf %2, %4 : vector<4x96xf32>
    %6 = vector.extract_strided_slice %5 {offsets = [0, 0], sizes = [4, 32], strides = [1, 1]} : vector<4x96xf32> to vector<4x32xf32>
    %7 = vector.extract_strided_slice %5 {offsets = [0, 32], sizes = [4, 32], strides = [1, 1]} : vector<4x96xf32> to vector<4x32xf32>
    %8 = vector.extract_strided_slice %5 {offsets = [0, 64], sizes = [4, 32], strides = [1, 1]} : vector<4x96xf32> to vector<4x32xf32>
    %9 = tpu.iota {dimensions = array<i32: 1>} : vector<4x32xi32>
    %c8_i32 = arith.constant 8 : i32
    %c0_i32 = arith.constant 0 : i32
    %10 = arith.cmpi eq, %c8_i32, %c0_i32 : i32
    %c1_i32 = arith.constant 1 : i32
    %11 = arith.select %10, %c1_i32, %c8_i32 : i32
    %12 = vector.broadcast %11 : i32 to vector<4x32xi32>
    %13 = arith.remsi %9, %12 : vector<4x32xi32>
    %c0_i32_5 = arith.constant 0 : i32
    %14 = vector.broadcast %c0_i32_5 : i32 to vector<4x32xi32>
    %15 = arith.cmpi ne, %13, %14 : vector<4x32xi32>
    %c0_i32_6 = arith.constant 0 : i32
    %16 = vector.broadcast %c0_i32_6 : i32 to vector<4x32xi32>
    %17 = arith.cmpi slt, %13, %16 : vector<4x32xi32>
    %c0_i32_7 = arith.constant 0 : i32
    %18 = arith.cmpi slt, %11, %c0_i32_7 : i32
    %19 = vector.broadcast %18 : i1 to vector<4x32xi1>
    %20 = vector.broadcast %19 : vector<4x32xi1> to vector<4x32xi1>
    %21 = arith.xori %17, %20 : vector<4x32xi1>
    %22 = arith.andi %21, %15 : vector<4x32xi1>
    %23 = vector.broadcast %11 : i32 to vector<4x32xi32>
    %24 = arith.addi %13, %23 : vector<4x32xi32>
    %25 = arith.select %22, %24, %13 : vector<4x32xi1>, vector<4x32xi32>
    %c0_8 = arith.constant 0 : index
    %c0_9 = arith.constant 0 : index
    %26 = vector.load %arg4[%c0_8, %c0_9] : memref<32x32xbf16, #tpu.memory_space<vmem>>, vector<32x32xbf16>
    %cst_10 = arith.constant 0xFF800000 : f32
    %27 = vector.broadcast %cst_10 : f32 to vector<4x32xf32>
    %cst_11 = arith.constant 0x7F800000 : f32
    %28 = vector.broadcast %cst_11 : f32 to vector<4x32xf32>
    %c0_i32_12 = arith.constant 0 : i32
    %29 = vector.broadcast %c0_i32_12 : i32 to vector<4x32xi32>
    %30 = arith.cmpi eq, %25, %29 : vector<4x32xi32>
    %cst_13 = arith.constant 0.000000e+00 : f32
    %31 = vector.broadcast %cst_13 : f32 to vector<4x32xf32>
    %32 = arith.select %30, %7, %31 : vector<4x32xi1>, vector<4x32xf32>
    %33 = arith.truncf %32 : vector<4x32xf32> to vector<4x32xbf16>
    %cst_14 = arith.constant dense<0.000000e+00> : vector<4x32xf32>
    %34 = tpu.matmul %33, %26, %cst_14 {dimension_numbers = #tpu.dot_dimension_numbers<[1], [0], [0], [1], [0, 0, 1, 1], [], []>} : vector<4x32xbf16>, vector<32x32xbf16>, vector<4x32xf32> -> vector<4x32xf32>
    %35 = arith.maximumf %27, %34 : vector<4x32xf32>
    %36 = arith.minimumf %28, %34 : vector<4x32xf32>
    %c1_i32_15 = arith.constant 1 : i32
    %37 = vector.broadcast %c1_i32_15 : i32 to vector<4x32xi32>
    %38 = arith.cmpi eq, %25, %37 : vector<4x32xi32>
    %cst_16 = arith.constant 0.000000e+00 : f32
    %39 = vector.broadcast %cst_16 : f32 to vector<4x32xf32>
    %40 = arith.select %38, %7, %39 : vector<4x32xi1>, vector<4x32xf32>
    %41 = arith.truncf %40 : vector<4x32xf32> to vector<4x32xbf16>
    %cst_17 = arith.constant dense<0.000000e+00> : vector<4x32xf32>
    %42 = tpu.matmul %41, %26, %cst_17 {dimension_numbers = #tpu.dot_dimension_numbers<[1], [0], [0], [1], [0, 0, 1, 1], [], []>} : vector<4x32xbf16>, vector<32x32xbf16>, vector<4x32xf32> -> vector<4x32xf32>
    %43 = arith.maximumf %35, %42 : vector<4x32xf32>
    %44 = arith.minimumf %36, %42 : vector<4x32xf32>
    %c2_i32 = arith.constant 2 : i32
    %45 = vector.broadcast %c2_i32 : i32 to vector<4x32xi32>
    %46 = arith.cmpi eq, %25, %45 : vector<4x32xi32>
    %cst_18 = arith.constant 0.000000e+00 : f32
    %47 = vector.broadcast %cst_18 : f32 to vector<4x32xf32>
    %48 = arith.select %46, %7, %47 : vector<4x32xi1>, vector<4x32xf32>
    %49 = arith.truncf %48 : vector<4x32xf32> to vector<4x32xbf16>
    %cst_19 = arith.constant dense<0.000000e+00> : vector<4x32xf32>
    %50 = tpu.matmul %49, %26, %cst_19 {dimension_numbers = #tpu.dot_dimension_numbers<[1], [0], [0], [1], [0, 0, 1, 1], [], []>} : vector<4x32xbf16>, vector<32x32xbf16>, vector<4x32xf32> -> vector<4x32xf32>
    %51 = arith.maximumf %43, %50 : vector<4x32xf32>
    %52 = arith.minimumf %44, %50 : vector<4x32xf32>
    %c3_i32 = arith.constant 3 : i32
    %53 = vector.broadcast %c3_i32 : i32 to vector<4x32xi32>
    %54 = arith.cmpi eq, %25, %53 : vector<4x32xi32>
    %cst_20 = arith.constant 0.000000e+00 : f32
    %55 = vector.broadcast %cst_20 : f32 to vector<4x32xf32>
    %56 = arith.select %54, %7, %55 : vector<4x32xi1>, vector<4x32xf32>
    %57 = arith.truncf %56 : vector<4x32xf32> to vector<4x32xbf16>
    %cst_21 = arith.constant dense<0.000000e+00> : vector<4x32xf32>
    %58 = tpu.matmul %57, %26, %cst_21 {dimension_numbers = #tpu.dot_dimension_numbers<[1], [0], [0], [1], [0, 0, 1, 1], [], []>} : vector<4x32xbf16>, vector<32x32xbf16>, vector<4x32xf32> -> vector<4x32xf32>
    %59 = arith.maximumf %51, %58 : vector<4x32xf32>
    %60 = arith.minimumf %52, %58 : vector<4x32xf32>
    %c4_i32 = arith.constant 4 : i32
    %61 = vector.broadcast %c4_i32 : i32 to vector<4x32xi32>
    %62 = arith.cmpi eq, %25, %61 : vector<4x32xi32>
    %cst_22 = arith.constant 0.000000e+00 : f32
    %63 = vector.broadcast %cst_22 : f32 to vector<4x32xf32>
    %64 = arith.select %62, %7, %63 : vector<4x32xi1>, vector<4x32xf32>
    %65 = arith.truncf %64 : vector<4x32xf32> to vector<4x32xbf16>
    %cst_23 = arith.constant dense<0.000000e+00> : vector<4x32xf32>
    %66 = tpu.matmul %65, %26, %cst_23 {dimension_numbers = #tpu.dot_dimension_numbers<[1], [0], [0], [1], [0, 0, 1, 1], [], []>} : vector<4x32xbf16>, vector<32x32xbf16>, vector<4x32xf32> -> vector<4x32xf32>
    %67 = arith.maximumf %59, %66 : vector<4x32xf32>
    %68 = arith.minimumf %60, %66 : vector<4x32xf32>
    %c5_i32 = arith.constant 5 : i32
    %69 = vector.broadcast %c5_i32 : i32 to vector<4x32xi32>
    %70 = arith.cmpi eq, %25, %69 : vector<4x32xi32>
    %cst_24 = arith.constant 0.000000e+00 : f32
    %71 = vector.broadcast %cst_24 : f32 to vector<4x32xf32>
    %72 = arith.select %70, %7, %71 : vector<4x32xi1>, vector<4x32xf32>
    %73 = arith.truncf %72 : vector<4x32xf32> to vector<4x32xbf16>
    %cst_25 = arith.constant dense<0.000000e+00> : vector<4x32xf32>
    %74 = tpu.matmul %73, %26, %cst_25 {dimension_numbers = #tpu.dot_dimension_numbers<[1], [0], [0], [1], [0, 0, 1, 1], [], []>} : vector<4x32xbf16>, vector<32x32xbf16>, vector<4x32xf32> -> vector<4x32xf32>
    %75 = arith.maximumf %67, %74 : vector<4x32xf32>
    %76 = arith.minimumf %68, %74 : vector<4x32xf32>
    %c6_i32 = arith.constant 6 : i32
    %77 = vector.broadcast %c6_i32 : i32 to vector<4x32xi32>
    %78 = arith.cmpi eq, %25, %77 : vector<4x32xi32>
    %cst_26 = arith.constant 0.000000e+00 : f32
    %79 = vector.broadcast %cst_26 : f32 to vector<4x32xf32>
    %80 = arith.select %78, %7, %79 : vector<4x32xi1>, vector<4x32xf32>
    %81 = arith.truncf %80 : vector<4x32xf32> to vector<4x32xbf16>
    %cst_27 = arith.constant dense<0.000000e+00> : vector<4x32xf32>
    %82 = tpu.matmul %81, %26, %cst_27 {dimension_numbers = #tpu.dot_dimension_numbers<[1], [0], [0], [1], [0, 0, 1, 1], [], []>} : vector<4x32xbf16>, vector<32x32xbf16>, vector<4x32xf32> -> vector<4x32xf32>
    %83 = arith.maximumf %75, %82 : vector<4x32xf32>
    %84 = arith.minimumf %76, %82 : vector<4x32xf32>
    %c7_i32 = arith.constant 7 : i32
    %85 = vector.broadcast %c7_i32 : i32 to vector<4x32xi32>
    %86 = arith.cmpi eq, %25, %85 : vector<4x32xi32>
    %cst_28 = arith.constant 0.000000e+00 : f32
    %87 = vector.broadcast %cst_28 : f32 to vector<4x32xf32>
    %88 = arith.select %86, %7, %87 : vector<4x32xi1>, vector<4x32xf32>
    %89 = arith.truncf %88 : vector<4x32xf32> to vector<4x32xbf16>
    %cst_29 = arith.constant dense<0.000000e+00> : vector<4x32xf32>
    %90 = tpu.matmul %89, %26, %cst_29 {dimension_numbers = #tpu.dot_dimension_numbers<[1], [0], [0], [1], [0, 0, 1, 1], [], []>} : vector<4x32xbf16>, vector<32x32xbf16>, vector<4x32xf32> -> vector<4x32xf32>
    %91 = arith.maximumf %83, %90 : vector<4x32xf32>
    %92 = arith.minimumf %84, %90 : vector<4x32xf32>
    %cst_30 = arith.constant 0.000000e+00 : f32
    %93 = vector.broadcast %cst_30 : f32 to vector<4x32xf32>
    %94 = arith.cmpf oge, %6, %93 : vector<4x32xf32>
    %95 = arith.mulf %6, %91 : vector<4x32xf32>
    %96 = arith.mulf %6, %92 : vector<4x32xf32>
    %97 = arith.select %94, %95, %96 : vector<4x32xi1>, vector<4x32xf32>
    %cst_31 = arith.constant 0.000000e+00 : f32
    %98 = vector.broadcast %cst_31 : f32 to vector<4x32xf32>
    %cst_32 = arith.constant 0.000000e+00 : f32
    %99 = vector.broadcast %cst_32 : f32 to vector<4x32xf32>
    %c0_i32_33 = arith.constant 0 : i32
    %100 = vector.broadcast %c0_i32_33 : i32 to vector<4x32xi32>
    %101 = arith.cmpi eq, %25, %100 : vector<4x32xi32>
    %cst_34 = arith.constant 0.000000e+00 : f32
    %102 = vector.broadcast %cst_34 : f32 to vector<4x32xf32>
    %103 = arith.select %101, %7, %102 : vector<4x32xi1>, vector<4x32xf32>
    %104 = arith.truncf %103 : vector<4x32xf32> to vector<4x32xbf16>
    %cst_35 = arith.constant dense<0.000000e+00> : vector<4x32xf32>
    %105 = tpu.matmul %104, %26, %cst_35 {dimension_numbers = #tpu.dot_dimension_numbers<[1], [0], [0], [1], [0, 0, 1, 1], [], []>} : vector<4x32xbf16>, vector<32x32xbf16>, vector<4x32xf32> -> vector<4x32xf32>
    %c0_i32_36 = arith.constant 0 : i32
    %106 = vector.broadcast %c0_i32_36 : i32 to vector<4x32xi32>
    %107 = arith.cmpi eq, %25, %106 : vector<4x32xi32>
    %cst_37 = arith.constant 0.000000e+00 : f32
    %108 = vector.broadcast %cst_37 : f32 to vector<4x32xf32>
    %109 = arith.select %107, %8, %108 : vector<4x32xi1>, vector<4x32xf32>
    %110 = arith.truncf %109 : vector<4x32xf32> to vector<4x32xbf16>
    %cst_38 = arith.constant dense<0.000000e+00> : vector<4x32xf32>
    %111 = tpu.matmul %110, %26, %cst_38 {dimension_numbers = #tpu.dot_dimension_numbers<[1], [0], [0], [1], [0, 0, 1, 1], [], []>} : vector<4x32xbf16>, vector<32x32xbf16>, vector<4x32xf32> -> vector<4x32xf32>
    %112 = arith.mulf %6, %105 : vector<4x32xf32>
    %113 = arith.subf %112, %97 : vector<4x32xf32>
    %114 = math.exp %113 : vector<4x32xf32>
    %115 = arith.addf %98, %114 : vector<4x32xf32>
    %116 = arith.mulf %114, %111 : vector<4x32xf32>
    %117 = arith.addf %99, %116 : vector<4x32xf32>
    %c1_i32_39 = arith.constant 1 : i32
    %118 = vector.broadcast %c1_i32_39 : i32 to vector<4x32xi32>
    %119 = arith.cmpi eq, %25, %118 : vector<4x32xi32>
    %cst_40 = arith.constant 0.000000e+00 : f32
    %120 = vector.broadcast %cst_40 : f32 to vector<4x32xf32>
    %121 = arith.select %119, %7, %120 : vector<4x32xi1>, vector<4x32xf32>
    %122 = arith.truncf %121 : vector<4x32xf32> to vector<4x32xbf16>
    %cst_41 = arith.constant dense<0.000000e+00> : vector<4x32xf32>
    %123 = tpu.matmul %122, %26, %cst_41 {dimension_numbers = #tpu.dot_dimension_numbers<[1], [0], [0], [1], [0, 0, 1, 1], [], []>} : vector<4x32xbf16>, vector<32x32xbf16>, vector<4x32xf32> -> vector<4x32xf32>
    %c1_i32_42 = arith.constant 1 : i32
    %124 = vector.broadcast %c1_i32_42 : i32 to vector<4x32xi32>
    %125 = arith.cmpi eq, %25, %124 : vector<4x32xi32>
    %cst_43 = arith.constant 0.000000e+00 : f32
    %126 = vector.broadcast %cst_43 : f32 to vector<4x32xf32>
    %127 = arith.select %125, %8, %126 : vector<4x32xi1>, vector<4x32xf32>
    %128 = arith.truncf %127 : vector<4x32xf32> to vector<4x32xbf16>
    %cst_44 = arith.constant dense<0.000000e+00> : vector<4x32xf32>
    %129 = tpu.matmul %128, %26, %cst_44 {dimension_numbers = #tpu.dot_dimension_numbers<[1], [0], [0], [1], [0, 0, 1, 1], [], []>} : vector<4x32xbf16>, vector<32x32xbf16>, vector<4x32xf32> -> vector<4x32xf32>
    %130 = arith.mulf %6, %123 : vector<4x32xf32>
    %131 = arith.subf %130, %97 : vector<4x32xf32>
    %132 = math.exp %131 : vector<4x32xf32>
    %133 = arith.addf %115, %132 : vector<4x32xf32>
    %134 = arith.mulf %132, %129 : vector<4x32xf32>
    %135 = arith.addf %117, %134 : vector<4x32xf32>
    %c2_i32_45 = arith.constant 2 : i32
    %136 = vector.broadcast %c2_i32_45 : i32 to vector<4x32xi32>
    %137 = arith.cmpi eq, %25, %136 : vector<4x32xi32>
    %cst_46 = arith.constant 0.000000e+00 : f32
    %138 = vector.broadcast %cst_46 : f32 to vector<4x32xf32>
    %139 = arith.select %137, %7, %138 : vector<4x32xi1>, vector<4x32xf32>
    %140 = arith.truncf %139 : vector<4x32xf32> to vector<4x32xbf16>
    %cst_47 = arith.constant dense<0.000000e+00> : vector<4x32xf32>
    %141 = tpu.matmul %140, %26, %cst_47 {dimension_numbers = #tpu.dot_dimension_numbers<[1], [0], [0], [1], [0, 0, 1, 1], [], []>} : vector<4x32xbf16>, vector<32x32xbf16>, vector<4x32xf32> -> vector<4x32xf32>
    %c2_i32_48 = arith.constant 2 : i32
    %142 = vector.broadcast %c2_i32_48 : i32 to vector<4x32xi32>
    %143 = arith.cmpi eq, %25, %142 : vector<4x32xi32>
    %cst_49 = arith.constant 0.000000e+00 : f32
    %144 = vector.broadcast %cst_49 : f32 to vector<4x32xf32>
    %145 = arith.select %143, %8, %144 : vector<4x32xi1>, vector<4x32xf32>
    %146 = arith.truncf %145 : vector<4x32xf32> to vector<4x32xbf16>
    %cst_50 = arith.constant dense<0.000000e+00> : vector<4x32xf32>
    %147 = tpu.matmul %146, %26, %cst_50 {dimension_numbers = #tpu.dot_dimension_numbers<[1], [0], [0], [1], [0, 0, 1, 1], [], []>} : vector<4x32xbf16>, vector<32x32xbf16>, vector<4x32xf32> -> vector<4x32xf32>
    %148 = arith.mulf %6, %141 : vector<4x32xf32>
    %149 = arith.subf %148, %97 : vector<4x32xf32>
    %150 = math.exp %149 : vector<4x32xf32>
    %151 = arith.addf %133, %150 : vector<4x32xf32>
    %152 = arith.mulf %150, %147 : vector<4x32xf32>
    %153 = arith.addf %135, %152 : vector<4x32xf32>
    %c3_i32_51 = arith.constant 3 : i32
    %154 = vector.broadcast %c3_i32_51 : i32 to vector<4x32xi32>
    %155 = arith.cmpi eq, %25, %154 : vector<4x32xi32>
    %cst_52 = arith.constant 0.000000e+00 : f32
    %156 = vector.broadcast %cst_52 : f32 to vector<4x32xf32>
    %157 = arith.select %155, %7, %156 : vector<4x32xi1>, vector<4x32xf32>
    %158 = arith.truncf %157 : vector<4x32xf32> to vector<4x32xbf16>
    %cst_53 = arith.constant dense<0.000000e+00> : vector<4x32xf32>
    %159 = tpu.matmul %158, %26, %cst_53 {dimension_numbers = #tpu.dot_dimension_numbers<[1], [0], [0], [1], [0, 0, 1, 1], [], []>} : vector<4x32xbf16>, vector<32x32xbf16>, vector<4x32xf32> -> vector<4x32xf32>
    %c3_i32_54 = arith.constant 3 : i32
    %160 = vector.broadcast %c3_i32_54 : i32 to vector<4x32xi32>
    %161 = arith.cmpi eq, %25, %160 : vector<4x32xi32>
    %cst_55 = arith.constant 0.000000e+00 : f32
    %162 = vector.broadcast %cst_55 : f32 to vector<4x32xf32>
    %163 = arith.select %161, %8, %162 : vector<4x32xi1>, vector<4x32xf32>
    %164 = arith.truncf %163 : vector<4x32xf32> to vector<4x32xbf16>
    %cst_56 = arith.constant dense<0.000000e+00> : vector<4x32xf32>
    %165 = tpu.matmul %164, %26, %cst_56 {dimension_numbers = #tpu.dot_dimension_numbers<[1], [0], [0], [1], [0, 0, 1, 1], [], []>} : vector<4x32xbf16>, vector<32x32xbf16>, vector<4x32xf32> -> vector<4x32xf32>
    %166 = arith.mulf %6, %159 : vector<4x32xf32>
    %167 = arith.subf %166, %97 : vector<4x32xf32>
    %168 = math.exp %167 : vector<4x32xf32>
    %169 = arith.addf %151, %168 : vector<4x32xf32>
    %170 = arith.mulf %168, %165 : vector<4x32xf32>
    %171 = arith.addf %153, %170 : vector<4x32xf32>
    %c4_i32_57 = arith.constant 4 : i32
    %172 = vector.broadcast %c4_i32_57 : i32 to vector<4x32xi32>
    %173 = arith.cmpi eq, %25, %172 : vector<4x32xi32>
    %cst_58 = arith.constant 0.000000e+00 : f32
    %174 = vector.broadcast %cst_58 : f32 to vector<4x32xf32>
    %175 = arith.select %173, %7, %174 : vector<4x32xi1>, vector<4x32xf32>
    %176 = arith.truncf %175 : vector<4x32xf32> to vector<4x32xbf16>
    %cst_59 = arith.constant dense<0.000000e+00> : vector<4x32xf32>
    %177 = tpu.matmul %176, %26, %cst_59 {dimension_numbers = #tpu.dot_dimension_numbers<[1], [0], [0], [1], [0, 0, 1, 1], [], []>} : vector<4x32xbf16>, vector<32x32xbf16>, vector<4x32xf32> -> vector<4x32xf32>
    %c4_i32_60 = arith.constant 4 : i32
    %178 = vector.broadcast %c4_i32_60 : i32 to vector<4x32xi32>
    %179 = arith.cmpi eq, %25, %178 : vector<4x32xi32>
    %cst_61 = arith.constant 0.000000e+00 : f32
    %180 = vector.broadcast %cst_61 : f32 to vector<4x32xf32>
    %181 = arith.select %179, %8, %180 : vector<4x32xi1>, vector<4x32xf32>
    %182 = arith.truncf %181 : vector<4x32xf32> to vector<4x32xbf16>
    %cst_62 = arith.constant dense<0.000000e+00> : vector<4x32xf32>
    %183 = tpu.matmul %182, %26, %cst_62 {dimension_numbers = #tpu.dot_dimension_numbers<[1], [0], [0], [1], [0, 0, 1, 1], [], []>} : vector<4x32xbf16>, vector<32x32xbf16>, vector<4x32xf32> -> vector<4x32xf32>
    %184 = arith.mulf %6, %177 : vector<4x32xf32>
    %185 = arith.subf %184, %97 : vector<4x32xf32>
    %186 = math.exp %185 : vector<4x32xf32>
    %187 = arith.addf %169, %186 : vector<4x32xf32>
    %188 = arith.mulf %186, %183 : vector<4x32xf32>
    %189 = arith.addf %171, %188 : vector<4x32xf32>
    %c5_i32_63 = arith.constant 5 : i32
    %190 = vector.broadcast %c5_i32_63 : i32 to vector<4x32xi32>
    %191 = arith.cmpi eq, %25, %190 : vector<4x32xi32>
    %cst_64 = arith.constant 0.000000e+00 : f32
    %192 = vector.broadcast %cst_64 : f32 to vector<4x32xf32>
    %193 = arith.select %191, %7, %192 : vector<4x32xi1>, vector<4x32xf32>
    %194 = arith.truncf %193 : vector<4x32xf32> to vector<4x32xbf16>
    %cst_65 = arith.constant dense<0.000000e+00> : vector<4x32xf32>
    %195 = tpu.matmul %194, %26, %cst_65 {dimension_numbers = #tpu.dot_dimension_numbers<[1], [0], [0], [1], [0, 0, 1, 1], [], []>} : vector<4x32xbf16>, vector<32x32xbf16>, vector<4x32xf32> -> vector<4x32xf32>
    %c5_i32_66 = arith.constant 5 : i32
    %196 = vector.broadcast %c5_i32_66 : i32 to vector<4x32xi32>
    %197 = arith.cmpi eq, %25, %196 : vector<4x32xi32>
    %cst_67 = arith.constant 0.000000e+00 : f32
    %198 = vector.broadcast %cst_67 : f32 to vector<4x32xf32>
    %199 = arith.select %197, %8, %198 : vector<4x32xi1>, vector<4x32xf32>
    %200 = arith.truncf %199 : vector<4x32xf32> to vector<4x32xbf16>
    %cst_68 = arith.constant dense<0.000000e+00> : vector<4x32xf32>
    %201 = tpu.matmul %200, %26, %cst_68 {dimension_numbers = #tpu.dot_dimension_numbers<[1], [0], [0], [1], [0, 0, 1, 1], [], []>} : vector<4x32xbf16>, vector<32x32xbf16>, vector<4x32xf32> -> vector<4x32xf32>
    %202 = arith.mulf %6, %195 : vector<4x32xf32>
    %203 = arith.subf %202, %97 : vector<4x32xf32>
    %204 = math.exp %203 : vector<4x32xf32>
    %205 = arith.addf %187, %204 : vector<4x32xf32>
    %206 = arith.mulf %204, %201 : vector<4x32xf32>
    %207 = arith.addf %189, %206 : vector<4x32xf32>
    %c6_i32_69 = arith.constant 6 : i32
    %208 = vector.broadcast %c6_i32_69 : i32 to vector<4x32xi32>
    %209 = arith.cmpi eq, %25, %208 : vector<4x32xi32>
    %cst_70 = arith.constant 0.000000e+00 : f32
    %210 = vector.broadcast %cst_70 : f32 to vector<4x32xf32>
    %211 = arith.select %209, %7, %210 : vector<4x32xi1>, vector<4x32xf32>
    %212 = arith.truncf %211 : vector<4x32xf32> to vector<4x32xbf16>
    %cst_71 = arith.constant dense<0.000000e+00> : vector<4x32xf32>
    %213 = tpu.matmul %212, %26, %cst_71 {dimension_numbers = #tpu.dot_dimension_numbers<[1], [0], [0], [1], [0, 0, 1, 1], [], []>} : vector<4x32xbf16>, vector<32x32xbf16>, vector<4x32xf32> -> vector<4x32xf32>
    %c6_i32_72 = arith.constant 6 : i32
    %214 = vector.broadcast %c6_i32_72 : i32 to vector<4x32xi32>
    %215 = arith.cmpi eq, %25, %214 : vector<4x32xi32>
    %cst_73 = arith.constant 0.000000e+00 : f32
    %216 = vector.broadcast %cst_73 : f32 to vector<4x32xf32>
    %217 = arith.select %215, %8, %216 : vector<4x32xi1>, vector<4x32xf32>
    %218 = arith.truncf %217 : vector<4x32xf32> to vector<4x32xbf16>
    %cst_74 = arith.constant dense<0.000000e+00> : vector<4x32xf32>
    %219 = tpu.matmul %218, %26, %cst_74 {dimension_numbers = #tpu.dot_dimension_numbers<[1], [0], [0], [1], [0, 0, 1, 1], [], []>} : vector<4x32xbf16>, vector<32x32xbf16>, vector<4x32xf32> -> vector<4x32xf32>
    %220 = arith.mulf %6, %213 : vector<4x32xf32>
    %221 = arith.subf %220, %97 : vector<4x32xf32>
    %222 = math.exp %221 : vector<4x32xf32>
    %223 = arith.addf %205, %222 : vector<4x32xf32>
    %224 = arith.mulf %222, %219 : vector<4x32xf32>
    %225 = arith.addf %207, %224 : vector<4x32xf32>
    %c7_i32_75 = arith.constant 7 : i32
    %226 = vector.broadcast %c7_i32_75 : i32 to vector<4x32xi32>
    %227 = arith.cmpi eq, %25, %226 : vector<4x32xi32>
    %cst_76 = arith.constant 0.000000e+00 : f32
    %228 = vector.broadcast %cst_76 : f32 to vector<4x32xf32>
    %229 = arith.select %227, %7, %228 : vector<4x32xi1>, vector<4x32xf32>
    %230 = arith.truncf %229 : vector<4x32xf32> to vector<4x32xbf16>
    %cst_77 = arith.constant dense<0.000000e+00> : vector<4x32xf32>
    %231 = tpu.matmul %230, %26, %cst_77 {dimension_numbers = #tpu.dot_dimension_numbers<[1], [0], [0], [1], [0, 0, 1, 1], [], []>} : vector<4x32xbf16>, vector<32x32xbf16>, vector<4x32xf32> -> vector<4x32xf32>
    %c7_i32_78 = arith.constant 7 : i32
    %232 = vector.broadcast %c7_i32_78 : i32 to vector<4x32xi32>
    %233 = arith.cmpi eq, %25, %232 : vector<4x32xi32>
    %cst_79 = arith.constant 0.000000e+00 : f32
    %234 = vector.broadcast %cst_79 : f32 to vector<4x32xf32>
    %235 = arith.select %233, %8, %234 : vector<4x32xi1>, vector<4x32xf32>
    %236 = arith.truncf %235 : vector<4x32xf32> to vector<4x32xbf16>
    %cst_80 = arith.constant dense<0.000000e+00> : vector<4x32xf32>
    %237 = tpu.matmul %236, %26, %cst_80 {dimension_numbers = #tpu.dot_dimension_numbers<[1], [0], [0], [1], [0, 0, 1, 1], [], []>} : vector<4x32xbf16>, vector<32x32xbf16>, vector<4x32xf32> -> vector<4x32xf32>
    %238 = arith.mulf %6, %231 : vector<4x32xf32>
    %239 = arith.subf %238, %97 : vector<4x32xf32>
    %240 = math.exp %239 : vector<4x32xf32>
    %241 = arith.addf %223, %240 : vector<4x32xf32>
    %242 = arith.mulf %240, %237 : vector<4x32xf32>
    %243 = arith.addf %225, %242 : vector<4x32xf32>
    %244 = tpu.reciprocal %241 : vector<4x32xf32> -> vector<4x32xf32>
    %245 = arith.mulf %243, %244 : vector<4x32xf32>
    %c0_81 = arith.constant 0 : index
    %c0_82 = arith.constant 0 : index
    %246 = vector.load %arg5[%c0_81, %c0_82] : memref<32x32xf32, #tpu.memory_space<vmem>>, vector<32x32xf32>
    %cst_83 = arith.constant dense<0.000000e+00> : vector<4x32xf32>
    %247 = tpu.matmul %245, %246, %cst_83 {dimension_numbers = #tpu.dot_dimension_numbers<[1], [0], [0], [1], [0, 0, 1, 1], [], []>} : vector<4x32xf32>, vector<32x32xf32>, vector<4x32xf32> -> vector<4x32xf32>
    %c0_84 = arith.constant 0 : index
    %c0_85 = arith.constant 0 : index
    %248 = vector.load %arg6[%c0_84, %c0_85] : memref<1x32xf32, #tpu.memory_space<vmem>>, vector<1x32xf32>
    %249 = vector.broadcast %248 : vector<1x32xf32> to vector<4x32xf32>
    %250 = arith.addf %247, %249 : vector<4x32xf32>
    %c0_86 = arith.constant 0 : index
    %c0_87 = arith.constant 0 : index
    %251 = vector.load %arg7[%c0_86, %c0_87] : memref<4x32xf32, #tpu.memory_space<vmem>>, vector<4x32xf32>
    tpu.vector_store %arg7[%c0_86, %c0_87], %250 {strides = array<i32>} : memref<4x32xf32, #tpu.memory_space<vmem>>, vector<4x32xf32>,
    return
  }
  func.func @transform_0(%arg0: i32) -> (i32, i32) {
    %c0_i32 = arith.constant 0 : i32
    %c0_i32_0 = arith.constant 0 : i32
    return %arg0, %c0_i32 : i32, i32
  }
  func.func @transform_1(%arg0: i32) -> (i32, i32) {
    %c0_i32 = arith.constant 0 : i32
    %c0_i32_0 = arith.constant 0 : i32
    %c0_i32_1 = arith.constant 0 : i32
    return %c0_i32, %c0_i32_0 : i32, i32
  }
  func.func @transform_2(%arg0: i32) -> (i32, i32) {
    %c0_i32 = arith.constant 0 : i32
    %c0_i32_0 = arith.constant 0 : i32
    %c0_i32_1 = arith.constant 0 : i32
    return %c0_i32, %c0_i32_0 : i32, i32
  }
  func.func @transform_3(%arg0: i32) -> (i32, i32) {
    %c0_i32 = arith.constant 0 : i32
    %c0_i32_0 = arith.constant 0 : i32
    %c0_i32_1 = arith.constant 0 : i32
    return %c0_i32, %c0_i32_0 : i32, i32
  }
  func.func @transform_4(%arg0: i32) -> (i32, i32) {
    %c0_i32 = arith.constant 0 : i32
    %c0_i32_0 = arith.constant 0 : i32
    %c0_i32_1 = arith.constant 0 : i32
    return %c0_i32, %c0_i32_0 : i32, i32
  }
  func.func @transform_5(%arg0: i32) -> (i32, i32) {
    %c0_i32 = arith.constant 0 : i32
    %c0_i32_0 = arith.constant 0 : i32
    %c0_i32_1 = arith.constant 0 : i32
    return %c0_i32, %c0_i32_0 : i32, i32
  }
  func.func @transform_6(%arg0: i32) -> (i32, i32) {
    %c0_i32 = arith.constant 0 : i32
    %c0_i32_0 = arith.constant 0 : i32
    return %arg0, %c0_i32 : i32, i32
  }
}

module attributes {stable_mosaic.version = 11 : i64} {
  func.func @attention_kernel(%arg0: i32, %arg1: memref<4x96xf32, #tpu.memory_space<vmem>>, %arg2: memref<96x96xf32, #tpu.memory_space<vmem>>, %arg3: memref<1x96xf32, #tpu.memory_space<vmem>>, %arg4: memref<32x32xbf16, #tpu.memory_space<vmem>>, %arg5: memref<32x32xf32, #tpu.memory_space<vmem>>, %arg6: memref<1x32xf32, #tpu.memory_space<vmem>>, %arg7: memref<4x32xf32, #tpu.memory_space<vmem>>) attributes {dimension_semantics = [#tpu.dimension_semantics<parallel>], iteration_bounds = array<i64: 1>, scalar_prefetch = 0 : i64, scratch_operands = 0 : i64, tpu.core_type = #tpu.core_type<tc>, window_params = [{transform_indices = @transform_0, window_bounds = array<i64: 4, 96>}, {pipeline_mode = #tpu.pipeline_mode<synchronous>, transform_indices = @transform_1, window_bounds = array<i64: 96, 96>}, {pipeline_mode = #tpu.pipeline_mode<synchronous>, transform_indices = @transform_2, window_bounds = array<i64: 1, 96>}, {pipeline_mode = #tpu.pipeline_mode<synchronous>, transform_indices = @transform_3, window_bounds = array<i64: 32, 32>}, {pipeline_mode = #tpu.pipeline_mode<synchronous>, transform_indices = @transform_4, window_bounds = array<i64: 32, 32>}, {pipeline_mode = #tpu.pipeline_mode<synchronous>, transform_indices = @transform_5, window_bounds = array<i64: 1, 32>}, {transform_indices = @transform_6, window_bounds = array<i64: 4, 32>}]} {
    %c0 = arith.constant 0 : index
    %c0_0 = arith.constant 0 : index
    %0 = vector.load %arg1[%c0, %c0_0] : memref<4x96xf32, #tpu.memory_space<vmem>>, vector<4x96xf32>
    %c0_1 = arith.constant 0 : index
    %c0_2 = arith.constant 0 : index
    %1 = vector.load %arg2[%c0_1, %c0_2] : memref<96x96xf32, #tpu.memory_space<vmem>>, vector<96x96xf32>
    %cst = arith.constant dense<0.000000e+00> : vector<4x96xf32>
    %2 = tpu.matmul %0, %1, %cst {dimension_numbers = #tpu.dot_dimension_numbers<[1], [0], [0], [1], [0, 0, 1, 1], [], []>} : vector<4x96xf32>, vector<96x96xf32>, vector<4x96xf32> -> vector<4x96xf32>
    %c0_3 = arith.constant 0 : index
    %c0_4 = arith.constant 0 : index
    %3 = vector.load %arg3[%c0_3, %c0_4] : memref<1x96xf32, #tpu.memory_space<vmem>>, vector<1x96xf32>
    %4 = vector.broadcast %3 : vector<1x96xf32> to vector<4x96xf32>
    %5 = arith.addf %2, %4 : vector<4x96xf32>
    %6 = vector.extract_strided_slice %5 {offsets = [0, 0], sizes = [4, 32], strides = [1, 1]} : vector<4x96xf32> to vector<4x32xf32>
    %7 = vector.extract_strided_slice %5 {offsets = [0, 32], sizes = [4, 32], strides = [1, 1]} : vector<4x96xf32> to vector<4x32xf32>
    %8 = vector.extract_strided_slice %5 {offsets = [0, 64], sizes = [4, 32], strides = [1, 1]} : vector<4x96xf32> to vector<4x32xf32>
    %9 = tpu.iota {dimensions = array<i32: 1>} : vector<4x32xi32>
    %c8_i32 = arith.constant 8 : i32
    %c0_i32 = arith.constant 0 : i32
    %10 = arith.cmpi eq, %c8_i32, %c0_i32 : i32
    %c1_i32 = arith.constant 1 : i32
    %11 = arith.select %10, %c1_i32, %c8_i32 : i32
    %12 = vector.broadcast %11 : i32 to vector<4x32xi32>
    %13 = arith.remsi %9, %12 : vector<4x32xi32>
    %c0_i32_5 = arith.constant 0 : i32
    %14 = vector.broadcast %c0_i32_5 : i32 to vector<4x32xi32>
    %15 = arith.cmpi ne, %13, %14 : vector<4x32xi32>
    %c0_i32_6 = arith.constant 0 : i32
    %16 = vector.broadcast %c0_i32_6 : i32 to vector<4x32xi32>
    %17 = arith.cmpi slt, %13, %16 : vector<4x32xi32>
    %c0_i32_7 = arith.constant 0 : i32
    %18 = arith.cmpi slt, %11, %c0_i32_7 : i32
    %19 = vector.broadcast %18 : i1 to vector<4x32xi1>
    %20 = vector.broadcast %19 : vector<4x32xi1> to vector<4x32xi1>
    %21 = arith.xori %17, %20 : vector<4x32xi1>
    %22 = arith.andi %21, %15 : vector<4x32xi1>
    %23 = vector.broadcast %11 : i32 to vector<4x32xi32>
    %24 = arith.addi %13, %23 : vector<4x32xi32>
    %25 = arith.select %22, %24, %13 : vector<4x32xi1>, vector<4x32xi32>
    %c0_8 = arith.constant 0 : index
    %c0_9 = arith.constant 0 : index
    %26 = vector.load %arg4[%c0_8, %c0_9] : memref<32x32xbf16, #tpu.memory_space<vmem>>, vector<32x32xbf16>
    %cst_10 = arith.constant 0xFF800000 : f32
    %27 = vector.broadcast %cst_10 : f32 to vector<4x32xf32>
    %cst_11 = arith.constant 0x7F800000 : f32
    %28 = vector.broadcast %cst_11 : f32 to vector<4x32xf32>
    %c0_i32_12 = arith.constant 0 : i32
    %29 = vector.broadcast %c0_i32_12 : i32 to vector<4x32xi32>
    %30 = arith.cmpi eq, %25, %29 : vector<4x32xi32>
    %cst_13 = arith.constant 0.000000e+00 : f32
    %31 = vector.broadcast %cst_13 : f32 to vector<4x32xf32>
    %32 = arith.select %30, %7, %31 : vector<4x32xi1>, vector<4x32xf32>
    %33 = arith.truncf %32 : vector<4x32xf32> to vector<4x32xbf16>
    %cst_14 = arith.constant dense<0.000000e+00> : vector<4x32xf32>
    %34 = tpu.matmul %33, %26, %cst_14 {dimension_numbers = #tpu.dot_dimension_numbers<[1], [0], [0], [1], [0, 0, 1, 1], [], []>} : vector<4x32xbf16>, vector<32x32xbf16>, vector<4x32xf32> -> vector<4x32xf32>
    %35 = arith.maximumf %27, %34 : vector<4x32xf32>
    %36 = arith.minimumf %28, %34 : vector<4x32xf32>
    %c1_i32_15 = arith.constant 1 : i32
    %37 = vector.broadcast %c1_i32_15 : i32 to vector<4x32xi32>
    %38 = arith.cmpi eq, %25, %37 : vector<4x32xi32>
    %cst_16 = arith.constant 0.000000e+00 : f32
    %39 = vector.broadcast %cst_16 : f32 to vector<4x32xf32>
    %40 = arith.select %38, %7, %39 : vector<4x32xi1>, vector<4x32xf32>
    %41 = arith.truncf %40 : vector<4x32xf32> to vector<4x32xbf16>
    %cst_17 = arith.constant dense<0.000000e+00> : vector<4x32xf32>
    %42 = tpu.matmul %41, %26, %cst_17 {dimension_numbers = #tpu.dot_dimension_numbers<[1], [0], [0], [1], [0, 0, 1, 1], [], []>} : vector<4x32xbf16>, vector<32x32xbf16>, vector<4x32xf32> -> vector<4x32xf32>
    %43 = arith.maximumf %35, %42 : vector<4x32xf32>
    %44 = arith.minimumf %36, %42 : vector<4x32xf32>
    %c2_i32 = arith.constant 2 : i32
    %45 = vector.broadcast %c2_i32 : i32 to vector<4x32xi32>
    %46 = arith.cmpi eq, %25, %45 : vector<4x32xi32>
    %cst_18 = arith.constant 0.000000e+00 : f32
    %47 = vector.broadcast %cst_18 : f32 to vector<4x32xf32>
    %48 = arith.select %46, %7, %47 : vector<4x32xi1>, vector<4x32xf32>
    %49 = arith.truncf %48 : vector<4x32xf32> to vector<4x32xbf16>
    %cst_19 = arith.constant dense<0.000000e+00> : vector<4x32xf32>
    %50 = tpu.matmul %49, %26, %cst_19 {dimension_numbers = #tpu.dot_dimension_numbers<[1], [0], [0], [1], [0, 0, 1, 1], [], []>} : vector<4x32xbf16>, vector<32x32xbf16>, vector<4x32xf32> -> vector<4x32xf32>
    %51 = arith.maximumf %43, %50 : vector<4x32xf32>
    %52 = arith.minimumf %44, %50 : vector<4x32xf32>
    %c3_i32 = arith.constant 3 : i32
    %53 = vector.broadcast %c3_i32 : i32 to vector<4x32xi32>
    %54 = arith.cmpi eq, %25, %53 : vector<4x32xi32>
    %cst_20 = arith.constant 0.000000e+00 : f32
    %55 = vector.broadcast %cst_20 : f32 to vector<4x32xf32>
    %56 = arith.select %54, %7, %55 : vector<4x32xi1>, vector<4x32xf32>
    %57 = arith.truncf %56 : vector<4x32xf32> to vector<4x32xbf16>
    %cst_21 = arith.constant dense<0.000000e+00> : vector<4x32xf32>
    %58 = tpu.matmul %57, %26, %cst_21 {dimension_numbers = #tpu.dot_dimension_numbers<[1], [0], [0], [1], [0, 0, 1, 1], [], []>} : vector<4x32xbf16>, vector<32x32xbf16>, vector<4x32xf32> -> vector<4x32xf32>
    %59 = arith.maximumf %51, %58 : vector<4x32xf32>
    %60 = arith.minimumf %52, %58 : vector<4x32xf32>
    %c4_i32 = arith.constant 4 : i32
    %61 = vector.broadcast %c4_i32 : i32 to vector<4x32xi32>
    %62 = arith.cmpi eq, %25, %61 : vector<4x32xi32>
    %cst_22 = arith.constant 0.000000e+00 : f32
    %63 = vector.broadcast %cst_22 : f32 to vector<4x32xf32>
    %64 = arith.select %62, %7, %63 : vector<4x32xi1>, vector<4x32xf32>
    %65 = arith.truncf %64 : vector<4x32xf32> to vector<4x32xbf16>
    %cst_23 = arith.constant dense<0.000000e+00> : vector<4x32xf32>
    %66 = tpu.matmul %65, %26, %cst_23 {dimension_numbers = #tpu.dot_dimension_numbers<[1], [0], [0], [1], [0, 0, 1, 1], [], []>} : vector<4x32xbf16>, vector<32x32xbf16>, vector<4x32xf32> -> vector<4x32xf32>
    %67 = arith.maximumf %59, %66 : vector<4x32xf32>
    %68 = arith.minimumf %60, %66 : vector<4x32xf32>
    %c5_i32 = arith.constant 5 : i32
    %69 = vector.broadcast %c5_i32 : i32 to vector<4x32xi32>
    %70 = arith.cmpi eq, %25, %69 : vector<4x32xi32>
    %cst_24 = arith.constant 0.000000e+00 : f32
    %71 = vector.broadcast %cst_24 : f32 to vector<4x32xf32>
    %72 = arith.select %70, %7, %71 : vector<4x32xi1>, vector<4x32xf32>
    %73 = arith.truncf %72 : vector<4x32xf32> to vector<4x32xbf16>
    %cst_25 = arith.constant dense<0.000000e+00> : vector<4x32xf32>
    %74 = tpu.matmul %73, %26, %cst_25 {dimension_numbers = #tpu.dot_dimension_numbers<[1], [0], [0], [1], [0, 0, 1, 1], [], []>} : vector<4x32xbf16>, vector<32x32xbf16>, vector<4x32xf32> -> vector<4x32xf32>
    %75 = arith.maximumf %67, %74 : vector<4x32xf32>
    %76 = arith.minimumf %68, %74 : vector<4x32xf32>
    %c6_i32 = arith.constant 6 : i32
    %77 = vector.broadcast %c6_i32 : i32 to vector<4x32xi32>
    %78 = arith.cmpi eq, %25, %77 : vector<4x32xi32>
    %cst_26 = arith.constant 0.000000e+00 : f32
    %79 = vector.broadcast %cst_26 : f32 to vector<4x32xf32>
    %80 = arith.select %78, %7, %79 : vector<4x32xi1>, vector<4x32xf32>
    %81 = arith.truncf %80 : vector<4x32xf32> to vector<4x32xbf16>
    %cst_27 = arith.constant dense<0.000000e+00> : vector<4x32xf32>
    %82 = tpu.matmul %81, %26, %cst_27 {dimension_numbers = #tpu.dot_dimension_numbers<[1], [0], [0], [1], [0, 0, 1, 1], [], []>} : vector<4x32xbf16>, vector<32x32xbf16>, vector<4x32xf32> -> vector<4x32xf32>
    %83 = arith.maximumf %75, %82 : vector<4x32xf32>
    %84 = arith.minimumf %76, %82 : vector<4x32xf32>
    %c7_i32 = arith.constant 7 : i32
    %85 = vector.broadcast %c7_i32 : i32 to vector<4x32xi32>
    %86 = arith.cmpi eq, %25, %85 : vector<4x32xi32>
    %cst_28 = arith.constant 0.000000e+00 : f32
    %87 = vector.broadcast %cst_28 : f32 to vector<4x32xf32>
    %88 = arith.select %86, %7, %87 : vector<4x32xi1>, vector<4x32xf32>
    %89 = arith.truncf %88 : vector<4x32xf32> to vector<4x32xbf16>
    %cst_29 = arith.constant dense<0.000000e+00> : vector<4x32xf32>
    %90 = tpu.matmul %89, %26, %cst_29 {dimension_numbers = #tpu.dot_dimension_numbers<[1], [0], [0], [1], [0, 0, 1, 1], [], []>} : vector<4x32xbf16>, vector<32x32xbf16>, vector<4x32xf32> -> vector<4x32xf32>
    %91 = arith.maximumf %83, %90 : vector<4x32xf32>
    %92 = arith.minimumf %84, %90 : vector<4x32xf32>
    %cst_30 = arith.constant 0.000000e+00 : f32
    %93 = vector.broadcast %cst_30 : f32 to vector<4x32xf32>
    %94 = arith.cmpf oge, %6, %93 : vector<4x32xf32>
    %95 = arith.mulf %6, %91 : vector<4x32xf32>
    %96 = arith.mulf %6, %92 : vector<4x32xf32>
    %97 = arith.select %94, %95, %96 : vector<4x32xi1>, vector<4x32xf32>
    %cst_31 = arith.constant 0.000000e+00 : f32
    %98 = vector.broadcast %cst_31 : f32 to vector<4x32xf32>
    %cst_32 = arith.constant 0.000000e+00 : f32
    %99 = vector.broadcast %cst_32 : f32 to vector<4x32xf32>
    %c0_i32_33 = arith.constant 0 : i32
    %100 = vector.broadcast %c0_i32_33 : i32 to vector<4x32xi32>
    %101 = arith.cmpi eq, %25, %100 : vector<4x32xi32>
    %cst_34 = arith.constant 0.000000e+00 : f32
    %102 = vector.broadcast %cst_34 : f32 to vector<4x32xf32>
    %103 = arith.select %101, %7, %102 : vector<4x32xi1>, vector<4x32xf32>
    %104 = arith.truncf %103 : vector<4x32xf32> to vector<4x32xbf16>
    %cst_35 = arith.constant dense<0.000000e+00> : vector<4x32xf32>
    %105 = tpu.matmul %104, %26, %cst_35 {dimension_numbers = #tpu.dot_dimension_numbers<[1], [0], [0], [1], [0, 0, 1, 1], [], []>} : vector<4x32xbf16>, vector<32x32xbf16>, vector<4x32xf32> -> vector<4x32xf32>
    %c0_i32_36 = arith.constant 0 : i32
    %106 = vector.broadcast %c0_i32_36 : i32 to vector<4x32xi32>
    %107 = arith.cmpi eq, %25, %106 : vector<4x32xi32>
    %cst_37 = arith.constant 0.000000e+00 : f32
    %108 = vector.broadcast %cst_37 : f32 to vector<4x32xf32>
    %109 = arith.select %107, %8, %108 : vector<4x32xi1>, vector<4x32xf32>
    %110 = arith.truncf %109 : vector<4x32xf32> to vector<4x32xbf16>
    %cst_38 = arith.constant dense<0.000000e+00> : vector<4x32xf32>
    %111 = tpu.matmul %110, %26, %cst_38 {dimension_numbers = #tpu.dot_dimension_numbers<[1], [0], [0], [1], [0, 0, 1, 1], [], []>} : vector<4x32xbf16>, vector<32x32xbf16>, vector<4x32xf32> -> vector<4x32xf32>
    %112 = arith.mulf %6, %105 : vector<4x32xf32>
    %113 = arith.subf %112, %97 : vector<4x32xf32>
    %114 = math.exp %113 : vector<4x32xf32>
    %115 = arith.addf %98, %114 : vector<4x32xf32>
    %116 = arith.mulf %114, %111 : vector<4x32xf32>
    %117 = arith.addf %99, %116 : vector<4x32xf32>
    %c1_i32_39 = arith.constant 1 : i32
    %118 = vector.broadcast %c1_i32_39 : i32 to vector<4x32xi32>
    %119 = arith.cmpi eq, %25, %118 : vector<4x32xi32>
    %cst_40 = arith.constant 0.000000e+00 : f32
    %120 = vector.broadcast %cst_40 : f32 to vector<4x32xf32>
    %121 = arith.select %119, %7, %120 : vector<4x32xi1>, vector<4x32xf32>
    %122 = arith.truncf %121 : vector<4x32xf32> to vector<4x32xbf16>
    %cst_41 = arith.constant dense<0.000000e+00> : vector<4x32xf32>
    %123 = tpu.matmul %122, %26, %cst_41 {dimension_numbers = #tpu.dot_dimension_numbers<[1], [0], [0], [1], [0, 0, 1, 1], [], []>} : vector<4x32xbf16>, vector<32x32xbf16>, vector<4x32xf32> -> vector<4x32xf32>
    %c1_i32_42 = arith.constant 1 : i32
    %124 = vector.broadcast %c1_i32_42 : i32 to vector<4x32xi32>
    %125 = arith.cmpi eq, %25, %124 : vector<4x32xi32>
    %cst_43 = arith.constant 0.000000e+00 : f32
    %126 = vector.broadcast %cst_43 : f32 to vector<4x32xf32>
    %127 = arith.select %125, %8, %126 : vector<4x32xi1>, vector<4x32xf32>
    %128 = arith.truncf %127 : vector<4x32xf32> to vector<4x32xbf16>
    %cst_44 = arith.constant dense<0.000000e+00> : vector<4x32xf32>
    %129 = tpu.matmul %128, %26, %cst_44 {dimension_numbers = #tpu.dot_dimension_numbers<[1], [0], [0], [1], [0, 0, 1, 1], [], []>} : vector<4x32xbf16>, vector<32x32xbf16>, vector<4x32xf32> -> vector<4x32xf32>
    %130 = arith.mulf %6, %123 : vector<4x32xf32>
    %131 = arith.subf %130, %97 : vector<4x32xf32>
    %132 = math.exp %131 : vector<4x32xf32>
    %133 = arith.addf %115, %132 : vector<4x32xf32>
    %134 = arith.mulf %132, %129 : vector<4x32xf32>
    %135 = arith.addf %117, %134 : vector<4x32xf32>
    %c2_i32_45 = arith.constant 2 : i32
    %136 = vector.broadcast %c2_i32_45 : i32 to vector<4x32xi32>
    %137 = arith.cmpi eq, %25, %136 : vector<4x32xi32>
    %cst_46 = arith.constant 0.000000e+00 : f32
    %138 = vector.broadcast %cst_46 : f32 to vector<4x32xf32>
    %139 = arith.select %137, %7, %138 : vector<4x32xi1>, vector<4x32xf32>
    %140 = arith.truncf %139 : vector<4x32xf32> to vector<4x32xbf16>
    %cst_47 = arith.constant dense<0.000000e+00> : vector<4x32xf32>
    %141 = tpu.matmul %140, %26, %cst_47 {dimension_numbers = #tpu.dot_dimension_numbers<[1], [0], [0], [1], [0, 0, 1, 1], [], []>} : vector<4x32xbf16>, vector<32x32xbf16>, vector<4x32xf32> -> vector<4x32xf32>
    %c2_i32_48 = arith.constant 2 : i32
    %142 = vector.broadcast %c2_i32_48 : i32 to vector<4x32xi32>
    %143 = arith.cmpi eq, %25, %142 : vector<4x32xi32>
    %cst_49 = arith.constant 0.000000e+00 : f32
    %144 = vector.broadcast %cst_49 : f32 to vector<4x32xf32>
    %145 = arith.select %143, %8, %144 : vector<4x32xi1>, vector<4x32xf32>
    %146 = arith.truncf %145 : vector<4x32xf32> to vector<4x32xbf16>
    %cst_50 = arith.constant dense<0.000000e+00> : vector<4x32xf32>
    %147 = tpu.matmul %146, %26, %cst_50 {dimension_numbers = #tpu.dot_dimension_numbers<[1], [0], [0], [1], [0, 0, 1, 1], [], []>} : vector<4x32xbf16>, vector<32x32xbf16>, vector<4x32xf32> -> vector<4x32xf32>
    %148 = arith.mulf %6, %141 : vector<4x32xf32>
    %149 = arith.subf %148, %97 : vector<4x32xf32>
    %150 = math.exp %149 : vector<4x32xf32>
    %151 = arith.addf %133, %150 : vector<4x32xf32>
    %152 = arith.mulf %150, %147 : vector<4x32xf32>
    %153 = arith.addf %135, %152 : vector<4x32xf32>
    %c3_i32_51 = arith.constant 3 : i32
    %154 = vector.broadcast %c3_i32_51 : i32 to vector<4x32xi32>
    %155 = arith.cmpi eq, %25, %154 : vector<4x32xi32>
    %cst_52 = arith.constant 0.000000e+00 : f32
    %156 = vector.broadcast %cst_52 : f32 to vector<4x32xf32>
    %157 = arith.select %155, %7, %156 : vector<4x32xi1>, vector<4x32xf32>
    %158 = arith.truncf %157 : vector<4x32xf32> to vector<4x32xbf16>
    %cst_53 = arith.constant dense<0.000000e+00> : vector<4x32xf32>
    %159 = tpu.matmul %158, %26, %cst_53 {dimension_numbers = #tpu.dot_dimension_numbers<[1], [0], [0], [1], [0, 0, 1, 1], [], []>} : vector<4x32xbf16>, vector<32x32xbf16>, vector<4x32xf32> -> vector<4x32xf32>
    %c3_i32_54 = arith.constant 3 : i32
    %160 = vector.broadcast %c3_i32_54 : i32 to vector<4x32xi32>
    %161 = arith.cmpi eq, %25, %160 : vector<4x32xi32>
    %cst_55 = arith.constant 0.000000e+00 : f32
    %162 = vector.broadcast %cst_55 : f32 to vector<4x32xf32>
    %163 = arith.select %161, %8, %162 : vector<4x32xi1>, vector<4x32xf32>
    %164 = arith.truncf %163 : vector<4x32xf32> to vector<4x32xbf16>
    %cst_56 = arith.constant dense<0.000000e+00> : vector<4x32xf32>
    %165 = tpu.matmul %164, %26, %cst_56 {dimension_numbers = #tpu.dot_dimension_numbers<[1], [0], [0], [1], [0, 0, 1, 1], [], []>} : vector<4x32xbf16>, vector<32x32xbf16>, vector<4x32xf32> -> vector<4x32xf32>
    %166 = arith.mulf %6, %159 : vector<4x32xf32>
    %167 = arith.subf %166, %97 : vector<4x32xf32>
    %168 = math.exp %167 : vector<4x32xf32>
    %169 = arith.addf %151, %168 : vector<4x32xf32>
    %170 = arith.mulf %168, %165 : vector<4x32xf32>
    %171 = arith.addf %153, %170 : vector<4x32xf32>
    %c4_i32_57 = arith.constant 4 : i32
    %172 = vector.broadcast %c4_i32_57 : i32 to vector<4x32xi32>
    %173 = arith.cmpi eq, %25, %172 : vector<4x32xi32>
    %cst_58 = arith.constant 0.000000e+00 : f32
    %174 = vector.broadcast %cst_58 : f32 to vector<4x32xf32>
    %175 = arith.select %173, %7, %174 : vector<4x32xi1>, vector<4x32xf32>
    %176 = arith.truncf %175 : vector<4x32xf32> to vector<4x32xbf16>
    %cst_59 = arith.constant dense<0.000000e+00> : vector<4x32xf32>
    %177 = tpu.matmul %176, %26, %cst_59 {dimension_numbers = #tpu.dot_dimension_numbers<[1], [0], [0], [1], [0, 0, 1, 1], [], []>} : vector<4x32xbf16>, vector<32x32xbf16>, vector<4x32xf32> -> vector<4x32xf32>
    %c4_i32_60 = arith.constant 4 : i32
    %178 = vector.broadcast %c4_i32_60 : i32 to vector<4x32xi32>
    %179 = arith.cmpi eq, %25, %178 : vector<4x32xi32>
    %cst_61 = arith.constant 0.000000e+00 : f32
    %180 = vector.broadcast %cst_61 : f32 to vector<4x32xf32>
    %181 = arith.select %179, %8, %180 : vector<4x32xi1>, vector<4x32xf32>
    %182 = arith.truncf %181 : vector<4x32xf32> to vector<4x32xbf16>
    %cst_62 = arith.constant dense<0.000000e+00> : vector<4x32xf32>
    %183 = tpu.matmul %182, %26, %cst_62 {dimension_numbers = #tpu.dot_dimension_numbers<[1], [0], [0], [1], [0, 0, 1, 1], [], []>} : vector<4x32xbf16>, vector<32x32xbf16>, vector<4x32xf32> -> vector<4x32xf32>
    %184 = arith.mulf %6, %177 : vector<4x32xf32>
    %185 = arith.subf %184, %97 : vector<4x32xf32>
    %186 = math.exp %185 : vector<4x32xf32>
    %187 = arith.addf %169, %186 : vector<4x32xf32>
    %188 = arith.mulf %186, %183 : vector<4x32xf32>
    %189 = arith.addf %171, %188 : vector<4x32xf32>
    %c5_i32_63 = arith.constant 5 : i32
    %190 = vector.broadcast %c5_i32_63 : i32 to vector<4x32xi32>
    %191 = arith.cmpi eq, %25, %190 : vector<4x32xi32>
    %cst_64 = arith.constant 0.000000e+00 : f32
    %192 = vector.broadcast %cst_64 : f32 to vector<4x32xf32>
    %193 = arith.select %191, %7, %192 : vector<4x32xi1>, vector<4x32xf32>
    %194 = arith.truncf %193 : vector<4x32xf32> to vector<4x32xbf16>
    %cst_65 = arith.constant dense<0.000000e+00> : vector<4x32xf32>
    %195 = tpu.matmul %194, %26, %cst_65 {dimension_numbers = #tpu.dot_dimension_numbers<[1], [0], [0], [1], [0, 0, 1, 1], [], []>} : vector<4x32xbf16>, vector<32x32xbf16>, vector<4x32xf32> -> vector<4x32xf32>
    %c5_i32_66 = arith.constant 5 : i32
    %196 = vector.broadcast %c5_i32_66 : i32 to vector<4x32xi32>
    %197 = arith.cmpi eq, %25, %196 : vector<4x32xi32>
    %cst_67 = arith.constant 0.000000e+00 : f32
    %198 = vector.broadcast %cst_67 : f32 to vector<4x32xf32>
    %199 = arith.select %197, %8, %198 : vector<4x32xi1>, vector<4x32xf32>
    %200 = arith.truncf %199 : vector<4x32xf32> to vector<4x32xbf16>
    %cst_68 = arith.constant dense<0.000000e+00> : vector<4x32xf32>
    %201 = tpu.matmul %200, %26, %cst_68 {dimension_numbers = #tpu.dot_dimension_numbers<[1], [0], [0], [1], [0, 0, 1, 1], [], []>} : vector<4x32xbf16>, vector<32x32xbf16>, vector<4x32xf32> -> vector<4x32xf32>
    %202 = arith.mulf %6, %195 : vector<4x32xf32>
    %203 = arith.subf %202, %97 : vector<4x32xf32>
    %204 = math.exp %203 : vector<4x32xf32>
    %205 = arith.addf %187, %204 : vector<4x32xf32>
    %206 = arith.mulf %204, %201 : vector<4x32xf32>
    %207 = arith.addf %189, %206 : vector<4x32xf32>
    %c6_i32_69 = arith.constant 6 : i32
    %208 = vector.broadcast %c6_i32_69 : i32 to vector<4x32xi32>
    %209 = arith.cmpi eq, %25, %208 : vector<4x32xi32>
    %cst_70 = arith.constant 0.000000e+00 : f32
    %210 = vector.broadcast %cst_70 : f32 to vector<4x32xf32>
    %211 = arith.select %209, %7, %210 : vector<4x32xi1>, vector<4x32xf32>
    %212 = arith.truncf %211 : vector<4x32xf32> to vector<4x32xbf16>
    %cst_71 = arith.constant dense<0.000000e+00> : vector<4x32xf32>
    %213 = tpu.matmul %212, %26, %cst_71 {dimension_numbers = #tpu.dot_dimension_numbers<[1], [0], [0], [1], [0, 0, 1, 1], [], []>} : vector<4x32xbf16>, vector<32x32xbf16>, vector<4x32xf32> -> vector<4x32xf32>
    %c6_i32_72 = arith.constant 6 : i32
    %214 = vector.broadcast %c6_i32_72 : i32 to vector<4x32xi32>
    %215 = arith.cmpi eq, %25, %214 : vector<4x32xi32>
    %cst_73 = arith.constant 0.000000e+00 : f32
    %216 = vector.broadcast %cst_73 : f32 to vector<4x32xf32>
    %217 = arith.select %215, %8, %216 : vector<4x32xi1>, vector<4x32xf32>
    %218 = arith.truncf %217 : vector<4x32xf32> to vector<4x32xbf16>
    %cst_74 = arith.constant dense<0.000000e+00> : vector<4x32xf32>
    %219 = tpu.matmul %218, %26, %cst_74 {dimension_numbers = #tpu.dot_dimension_numbers<[1], [0], [0], [1], [0, 0, 1, 1], [], []>} : vector<4x32xbf16>, vector<32x32xbf16>, vector<4x32xf32> -> vector<4x32xf32>
    %220 = arith.mulf %6, %213 : vector<4x32xf32>
    %221 = arith.subf %220, %97 : vector<4x32xf32>
    %222 = math.exp %221 : vector<4x32xf32>
    %223 = arith.addf %205, %222 : vector<4x32xf32>
    %224 = arith.mulf %222, %219 : vector<4x32xf32>
    %225 = arith.addf %207, %224 : vector<4x32xf32>
    %c7_i32_75 = arith.constant 7 : i32
    %226 = vector.broadcast %c7_i32_75 : i32 to vector<4x32xi32>
    %227 = arith.cmpi eq, %25, %226 : vector<4x32xi32>
    %cst_76 = arith.constant 0.000000e+00 : f32
    %228 = vector.broadcast %cst_76 : f32 to vector<4x32xf32>
    %229 = arith.select %227, %7, %228 : vector<4x32xi1>, vector<4x32xf32>
    %230 = arith.truncf %229 : vector<4x32xf32> to vector<4x32xbf16>
    %cst_77 = arith.constant dense<0.000000e+00> : vector<4x32xf32>
    %231 = tpu.matmul %230, %26, %cst_77 {dimension_numbers = #tpu.dot_dimension_numbers<[1], [0], [0], [1], [0, 0, 1, 1], [], []>} : vector<4x32xbf16>, vector<32x32xbf16>, vector<4x32xf32> -> vector<4x32xf32>
    %c7_i32_78 = arith.constant 7 : i32
    %232 = vector.broadcast %c7_i32_78 : i32 to vector<4x32xi32>
    %233 = arith.cmpi eq, %25, %232 : vector<4x32xi32>
    %cst_79 = arith.constant 0.000000e+00 : f32
    %234 = vector.broadcast %cst_79 : f32 to vector<4x32xf32>
    %235 = arith.select %233, %8, %234 : vector<4x32xi1>, vector<4x32xf32>
    %236 = arith.truncf %235 : vector<4x32xf32> to vector<4x32xbf16>
    %cst_80 = arith.constant dense<0.000000e+00> : vector<4x32xf32>
    %237 = tpu.matmul %236, %26, %cst_80 {dimension_numbers = #tpu.dot_dimension_numbers<[1], [0], [0], [1], [0, 0, 1, 1], [], []>} : vector<4x32xbf16>, vector<32x32xbf16>, vector<4x32xf32> -> vector<4x32xf32>
    %238 = arith.mulf %6, %231 : vector<4x32xf32>
    %239 = arith.subf %238, %97 : vector<4x32xf32>
    %240 = math.exp %239 : vector<4x32xf32>
    %241 = arith.addf %223, %240 : vector<4x32xf32>
    %242 = arith.mulf %240, %237 : vector<4x32xf32>
    %243 = arith.addf %225, %242 : vector<4x32xf32>
    %244 = tpu.reciprocal %241 : vector<4x32xf32> -> vector<4x32xf32>
    %245 = arith.mulf %243, %244 : vector<4x32xf32>
    %c0_81 = arith.constant 0 : index
    %c0_82 = arith.constant 0 : index
    %246 = vector.load %arg5[%c0_81, %c0_82] : memref<32x32xf32, #tpu.memory_space<vmem>>, vector<32x32xf32>
    %cst_83 = arith.constant dense<0.000000e+00> : vector<4x32xf32>
    %247 = tpu.matmul %245, %246, %cst_83 {dimension_numbers = #tpu.dot_dimension_numbers<[1], [0], [0], [1], [0, 0, 1, 1], [], []>} : vector<4x32xf32>, vector<32x32xf32>, vector<4x32xf32> -> vector<4x32xf32>
    %c0_84 = arith.constant 0 : index
    %c0_85 = arith.constant 0 : index
    %248 = vector.load %arg6[%c0_84, %c0_85] : memref<1x32xf32, #tpu.memory_space<vmem>>, vector<1x32xf32>
    %249 = vector.broadcast %248 : vector<1x32xf32> to vector<4x32xf32>
    %250 = arith.addf %247, %249 : vector<4x32xf32>
    %c0_86 = arith.constant 0 : index
    %c0_87 = arith.constant 0 : index
    %251 = vector.load %arg7[%c0_86, %c0_87] : memref<4x32xf32, #tpu.memory_space<vmem>>, vector<4x32xf32>
    tpu.vector_store %arg7[%c0_86, %c0_87], %250 {strides = array<i32>} : memref<4x32xf32, #tpu.memory_space<vmem>>, vector<4x32xf32>,
    return
  }
  func.func @transform_0(%arg0: i32) -> (i32, i32) {
    %c0_i32 = arith.constant 0 : i32
    %c0_i32_0 = arith.constant 0 : i32
    return %arg0, %c0_i32 : i32, i32
  }
  func.func @transform_1(%arg0: i32) -> (i32, i32) {
    %c0_i32 = arith.constant 0 : i32
    %c0_i32_0 = arith.constant 0 : i32
    %c0_i32_1 = arith.constant 0 : i32
    return %c0_i32, %c0_i32_0 : i32, i32
  }
  func.func @transform_2(%arg0: i32) -> (i32, i32) {
    %c0_i32 = arith.constant 0 : i32
    %c0_i32_0 = arith.constant 0 : i32
    %c0_i32_1 = arith.constant 0 : i32
    return %c0_i32, %c0_i32_0 : i32, i32
  }
  func.func @transform_3(%arg0: i32) -> (i32, i32) {
    %c0_i32 = arith.constant 0 : i32
    %c0_i32_0 = arith.constant 0 : i32
    %c0_i32_1 = arith.constant 0 : i32
    return %c0_i32, %c0_i32_0 : i32, i32
  }
  func.func @transform_4(%arg0: i32) -> (i32, i32) {
    %c0_i32 = arith.constant 0 : i32
    %c0_i32_0 = arith.constant 0 : i32
    %c0_i32_1 = arith.constant 0 : i32
    return %c0_i32, %c0_i32_0 : i32, i32
  }
  func.func @transform_5(%arg0: i32) -> (i32, i32) {
    %c0_i32 = arith.constant 0 : i32
    %c0_i32_0 = arith.constant 0 : i32
    %c0_i32_1 = arith.constant 0 : i32
    return %c0_i32, %c0_i32_0 : i32, i32
  }
  func.func @transform_6(%arg0: i32) -> (i32, i32) {
    %c0_i32 = arith.constant 0 : i32
    %c0_i32_0 = arith.constant 0 : i32
    return %arg0, %c0_i32 : i32, i32
  }
}

</mosaic_0001>

<bundles_post_ra>
// kernel: tpu_custom_call.1
= control target key start
LH: loop header
LB: loop body
LE: loop exit
PB: predicated region body
PF: predicated region fallthrough
CT: control target
= control target key end

     0   :  { %11 = vsyncpa [#allocation3], 0  ;;  %s1881_s0 = inlined_call_operand.hbm [shape: f32[4,96], index: 0, kind: input, shape index: {}]   ;;  %s1882_s1 = inlined_call_operand.hbm [shape: f32[96,96], index: 1, kind: input, shape index: {}]   ;;  %s1883_s2 = inlined_call_operand.vmem [shape: f32[1,96], index: 2, kind: input, shape index: {}]   ;;  %s1884_s3 = inlined_call_operand.hbm [shape: bf16[32,32], index: 3, kind: input, shape index: {}]   ;;  %s1885_s4 = inlined_call_operand.hbm [shape: f32[32,32], index: 4, kind: input, shape index: {}]   ;;  %s1886_s5 = inlined_call_operand.vmem [shape: f32[1,32], index: 5, kind: input, shape index: {}]   ;;  %s1887_s6 = inlined_call_operand.hbm [shape: f32[4,32], index: 6, kind: output, shape index: {}]  }
   0x1   :  { %12 = vsyncpa [#allocation6], 0 }
   0x2   :  { %13 = vsyncpa [#allocation9], 0 }
   0x3   :  { %14 = vsyncpa [#allocation4], 0  ;;  %s1546_s21 = smov [#allocation5]   ;;  %s1428_s25 = scalar_lea.hbm %s1882_s1, 1536 }
   0x4   :  { %s30_s22 = sshll.u32 %s1546_s21, 4  ;;  %p1429_p0 = scmp.ne.s32.totalorder %s1882_s1, %s1428_s25  ;;  %s31_s22 = int_to_ptr.vmem [resolvable:$true] %s30_s22 }
   0x5   :  { %p1432_p1 = scmp.lt.u32.totalorder %s1428_s25, %s1882_s1 }
   0x7   :  { %p1434_p2 = pnand %p1432_p1, %p1429_p0 }
   0x9   :  { %1437 = shalt.err (!%p1434_p2)
}
   0xa   :  { %s1438_s30 = scalar_lea.vmem %s31_s22, 1536  ;;  %p1443_p4 = scmp.lt.s32.totalorder %s31_s22, %s31_s22 }
   0xb   :  { %p1439_p3 = scmp.ne.s32.totalorder %s31_s22, %s1438_s30  ;;  %p1444_p5 = scmp.lt.s32.totalorder %s1438_s30, %s1438_s30 }
   0xd   :  { %p1445_p6 = por %p1444_p5, %p1443_p4 }
   0xf   :  { %p1446_p7 = pnand %p1445_p6, %p1439_p3 }
  0x11   :  { %1449 = shalt.err (!%p1446_p7)
}
  0x12   :  { %s1547_s7 = smov 128   ;;  %s1548_s8 = smov 8  }
  0x13   :  { %36 = dma.hbm_to_vmem [thread:$0]  %s1882_s1, 1536, %s31_s22, [#allocation6], %s1547_s7, %s1547_s7, %s1548_s8  }
  0x14   :  { %s1549_s11 = smov [#allocation2]   ;;  %s1550_s13 = smov [#allocation7]  }
  0x15   :  { %s21_s12 = sshll.u32 %s1549_s11, 4  ;;  %s44_s14 = sshll.u32 %s1550_s13, 4  ;;  %s22_s12 = int_to_ptr.vmem [resolvable:$true] %s21_s12  ;;  %s45_s14 = int_to_ptr.vmem [resolvable:$true] %s44_s14 }
  0x16   :  { %s1450_s17 = scalar_lea.hbm %s1881_s0, 64 }
  0x17   :  { %p1451_p8 = scmp.ne.s32.totalorder %s1881_s0, %s1450_s17  ;;  %p1454_p9 = scmp.lt.u32.totalorder %s1450_s17, %s1881_s0 }
  0x19   :  { %p1456_p10 = pnand %p1454_p9, %p1451_p8 }
  0x1b   :  { %1459 = shalt.err (!%p1456_p10)
}
  0x1c   :  { %s1460_s1 = scalar_lea.vmem %s22_s12, 64  ;;  %p1465_p12 = scmp.lt.s32.totalorder %s22_s12, %s22_s12 }
  0x1d   :  { %p1461_p11 = scmp.ne.s32.totalorder %s22_s12, %s1460_s1  ;;  %p1466_p13 = scmp.lt.s32.totalorder %s1460_s1, %s1460_s1 }
  0x1f   :  { %p1467_p0 = por %p1466_p13, %p1465_p12 }
  0x21   :  { %p1468_p1 = pnand %p1467_p0, %p1461_p11 }
  0x23   :  { %1471 = shalt.err (!%p1468_p1)
}
  0x24   :  { %24 = dma.hbm_to_vmem [thread:$0]  %s1881_s0, 64, %s22_s12, [#allocation3]  }
  0x25   :  { %s1472_s26 = scalar_lea.hbm %s1884_s3, 256 }
  0x26   :  { %p1473_p2 = scmp.ne.s32.totalorder %s1884_s3, %s1472_s26  ;;  %p1476_p3 = scmp.lt.u32.totalorder %s1472_s26, %s1884_s3 }
  0x28   :  { %p1478_p4 = pnand %p1476_p3, %p1473_p2 }
  0x2a   :  { %1481 = shalt.err (!%p1478_p4)
}
  0x2b   :  { %s1482_s9 = scalar_lea.vmem %s45_s14, 256  ;;  %p1487_p6 = scmp.lt.s32.totalorder %s45_s14, %s45_s14 }
  0x2c   :  { %p1483_p5 = scmp.ne.s32.totalorder %s45_s14, %s1482_s9  ;;  %p1488_p7 = scmp.lt.s32.totalorder %s1482_s9, %s1482_s9 }
  0x2e   :  { %p1489_p8 = por %p1488_p7, %p1487_p6 }
  0x30   :  { %p1490_p9 = pnand %p1489_p8, %p1483_p5 }
  0x32   :  { %1493 = shalt.err (!%p1490_p9)
}
  0x33   :  { %s1551_s0 = smov 64   ;;  %s1552_s10 = smov 4  }
  0x34   :  { %50 = dma.hbm_to_vmem [thread:$0]  %s1884_s3, 256, %s45_s14, [#allocation6], %s1551_s0, %s1551_s0, %s1552_s10  }
  0x35   :  { %s1553_s13 = smov [#allocation8]   ;;  %s1494_s18 = scalar_lea.hbm %s1885_s4, 512 }
  0x36   :  { %s56_s15 = sshll.u32 %s1553_s13, 4  ;;  %p1495_p10 = scmp.ne.s32.totalorder %s1885_s4, %s1494_s18  ;;  %s57_s15 = int_to_ptr.vmem [resolvable:$true] %s56_s15 }
  0x37   :  { %p1498_p11 = scmp.lt.u32.totalorder %s1494_s18, %s1885_s4 }
  0x39   :  { %p1500_p12 = pnand %p1498_p11, %p1495_p10 }
  0x3b   :  { %1503 = shalt.err (!%p1500_p12)
}
  0x3c   :  { %s1504_s22 = scalar_lea.vmem %s57_s15, 512  ;;  %p1509_p0 = scmp.lt.s32.totalorder %s57_s15, %s57_s15 }
  0x3d   :  { %p1505_p13 = scmp.ne.s32.totalorder %s57_s15, %s1504_s22  ;;  %p1510_p1 = scmp.lt.s32.totalorder %s1504_s22, %s1504_s22 }
  0x3f   :  { %p1511_p2 = por %p1510_p1, %p1509_p0 }
  0x41   :  { %p1512_p3 = pnand %p1511_p2, %p1505_p13 }
  0x43   :  { %1515 = shalt.err (!%p1512_p3)
}
  0x44   :  { %62 = dma.hbm_to_vmem [thread:$0]  %s1885_s4, 512, %s57_s15, [#allocation9], %s1547_s7, %s1547_s7, %s1548_s8  }
  0x45   :  { %1538 = dma.done.wait [#allocation3], 64  }
  0x46   :  { %1539 = vsyncadd [#allocation3], 4294967232 }
  0x47   :  { %1540 = dma.done.wait [#allocation6], 1792  }
  0x48   :  { %1541 = vsyncadd [#allocation6], 4294965504 }
  0x49   :  { %1542 = dma.done.wait [#allocation9], 512  }
  0x4a   :  { %1543 = vsyncadd [#allocation9], 4294966784  ;;  %v1554_v0 = vmov 0.0|0.0   ;;  %vm1555_vm0 = vmmov 0   ;;  %v1556_v1 = vmov 0.0   ;;  %v79_v2 = vld [vmem:[#allocation5] sm:$0xff]  ;;  %v172_v27 = vlaneseq }
  0x4b   :  { %1371 = vmatprep.subr.bf16.mxu0 %v1554_v0  ;;  %1229 = vmatprep.mubr.msk.f32.mxu0 %vm1555_vm0, %v1556_v1  ;;  %v80_v3 = vld [vmem:[#allocation5 + $0x8] sm:$0xff]  ;;  %v81_v4 = vld [vmem:[#allocation5 + $0x10] sm:$0xff]  ;;  %v82_v6 = vld [vmem:[#allocation5 + $0x18] sm:$0xff]  ;;  %vm98_vm1 = vcmask 785408   ;;  %s1557_s8 = smov 96   ;;  %vm209_vm4 = vcmask 261120  }
  0x4c   :  { %1232 = vmatprep.subr.bf16.mxu1 %v1556_v1  ;;  %1236 = vmatprep.mubr.msk.bf16.mxu1 %vm1555_vm0, %v1556_v1  ;;  %v1372_v5 = vpack.c.bf16 %v80_v3, %v79_v2  ;;  %v1375_v7 = vpack.c.bf16 %v82_v6, %v81_v4  ;;  %v83_v8 = vld [vmem:[#allocation5 + $0x20] sm:$0xff]  ;;  %v84_v9 = vld [vmem:[#allocation5 + $0x28] sm:$0xff]  ;;  %v85_v11 = vld [vmem:[#allocation5 + $0x30] sm:$0xff]  ;;  %v173_v28 = vand.u32 127, %v172_v27  ;;  %s1558_s24 = smov [#allocation10]   ;;  %vm1098_vm12 = vcmask 257024  }
  0x4d   :  { %v1378_v10 = vpack.c.bf16 %v84_v9, %v83_v8  ;;  %v86_v12 = vld [vmem:[#allocation5 + $0x38] sm:$0xff]  ;;  %v87_v14 = vld [vmem:[#allocation5 + $0x40] sm:$0xff]  ;;  %v88_v15 = vld [vmem:[#allocation5 + $0x48] sm:$0xff]  ;;  %s1106_s25 = sshll.u32 %s1558_s24, 4  ;;  %s1107_s25 = int_to_ptr.vmem [resolvable:$true] %s1106_s25 }
  0x4e   :  { %1373 = vmatpush3.bf16.msra.mxu0 %v1372_v5  ;;  %v1381_v13 = vpack.c.bf16 %v86_v12, %v85_v11  ;;  %v1384_v16 = vpack.c.bf16 %v88_v15, %v87_v14  ;;  %v89_v17 = vld [vmem:[#allocation5 + $0x50] sm:$0xff]  ;;  %v90_v18 = vld [vmem:[#allocation5 + $0x58] sm:$0xff]  ;;  %v1664_v21 = vld [vmem:[#allocation7] sm:$0xff]   ;;  %v1684_v29 = vand.u32 7, %v173_v28  ;;  %s1516_s26 = scalar_lea.vmem %s1107_s25, 64  ;;  %p1521_p5 = scmp.lt.s32.totalorder %s1107_s25, %s1107_s25 }
  0x4f   :  { %1374 = vmatprep.subr.bf16.mxu0 %v1554_v0  ;;  %v1387_v19 = vpack.c.bf16 %v90_v18, %v89_v17  ;;  %v78_v20 = vld [vmem:[#allocation2] sm:$0xf]  ;;  %1233 = vmatpush3.bf16.msra.mxu1 %v1664_v21  ;;  %v1668_v22 = vld [vmem:[#allocation7 + $0x8] sm:$0xff]   ;;  %v1014_v2 = vld [vmem:[#allocation8] sm:$0xff]  ;;  %p1517_p4 = scmp.ne.s32.totalorder %s1107_s25, %s1516_s26  ;;  %p1522_p6 = scmp.lt.s32.totalorder %s1516_s26, %s1516_s26 }
  0x50   :  { %1234 = vmatprep.subr.bf16.mxu1 %v1556_v1  ;;  %v1117_v23 = vld [vmem:[%s1883_s2] ss:$0 sm:$0xff]  ;;  %vm190_vm2 = vcmp.eq.s32.totalorder %v1684_v29, 0  ;;  %vm349_vm3 = vcmp.eq.s32.totalorder %v1684_v29, 3  ;;  %vm253_vm5 = vcmp.eq.s32.totalorder %v1684_v29, 1  ;;  %vm445_vm6 = vcmp.eq.s32.totalorder %v1684_v29, 5 }
  0x51   :  { %vm301_vm7 = vcmp.eq.s32.totalorder %v1684_v29, 2  ;;  %vm541_vm8 = vcmp.eq.s32.totalorder %v1684_v29, 7  ;;  %vm397_vm9 = vcmp.eq.s32.totalorder %v1684_v29, 4  ;;  %vm493_vm10 = vcmp.eq.s32.totalorder %v1684_v29, 6  ;;  %v1015_v3 = vld [vmem:[#allocation8 + $0x8] sm:$0xff]  ;;  %v1016_v5 = vld [vmem:[#allocation8 + $0x10] sm:$0xff]  ;;  %p1523_p7 = por %p1522_p6, %p1521_p5 }
  0x52   :  { %1376 = vmatpush3.bf16.msra.mxu0 %v1375_v7  ;;  %v1390_v4 = vpack.c.bf16 %v1015_v3, %v1014_v2  ;;  %v1017_v6 = vld [vmem:[#allocation8 + $0x18] sm:$0xff] }
  0x53   :  { %1377 = vmatprep.subr.bf16.mxu0 %v1554_v0  ;;  %1235 = vmatpush3.bf16.msra.mxu1 %v1668_v22  ;;  %v1393_v7 = vpack.c.bf16 %v1017_v6, %v1016_v5  ;;  %p1524_p8 = pnand %p1523_p7, %p1517_p4 }
  0x54   :  { %1240 = vmatprep.subr.bf16.mxu1 %v1556_v1 }
  0x56   :  { %1379 = vmatpush3.bf16.msra.mxu0 %v1378_v10 }
  0x57   :  { %1380 = vmatprep.subr.bf16.mxu0 %v1554_v0 }
  0x5a   :  { %1382 = vmatpush3.bf16.msra.mxu0 %v1381_v13 }
  0x5b   :  { %1383 = vmatprep.subr.bf16.mxu0 %v1554_v0 }
  0x5e   :  { %1385 = vmatpush3.bf16.msra.mxu0 %v1384_v16 }
  0x5f   :  { %1386 = vmatprep.subr.bf16.mxu0 %v1554_v0 }
  0x62   :  { %1388 = vmatpush3.bf16.msra.mxu0 %v1387_v19 }
  0x63   :  { %1256 = vmatprep.subr.bf16.mxu0 %v1556_v1 }
  0x65   :  { %1230 = vmatmul.mubr.msk.f32.vlgmr.msra.gmra.mrb[0].mxu0 %vm98_vm1, %v78_v20 }
  0x66   :  { %1260 = vmatprep.mubr.msk.bf16.mxu0 %vm1555_vm0, %v1556_v1  ;;  %1257 = vmatpush3.bf16.msra.mxu0 %v1664_v21 }
  0x67   :  { %1258 = vmatprep.subr.bf16.mxu0 %v1556_v1 }
  0x6a   :  { %1259 = vmatpush3.bf16.msra.mxu0 %v1668_v22 }
  0x6b   :  { %1272 = vmatprep.subr.bf16.mxu0 %v1556_v1 }
 0x138   :  { %v168_v24 = vpop.f32.mrb[0].mxu0 }
 0x139   :  { %v1679_v25 = vadd.f32 %v1117_v23, %v168_v24  ;;  %v1231_v26 = vpop.f32.mrb[1].mxu0 }
 0x13b   :  { %192 = vrot.lane.b32.xlu0 %v1679_v25, %s1557_s8  ;;  %vm589_vm11 = vcmp.ge.f32.partialorder %v1679_v25, 0.0 }
 0x13f   :  { %593 = vrot.lane.b32.xlu0 %v1679_v25, %s1551_s0 }
 0x1ad   :  { %v1688_v30 = vpop.permute.xlu0 %192 }
 0x1ae   :  { %v195_v31 = vsel %vm190_vm2, %v1688_v30, 0.0  ;;  %v350_v32 = vsel %vm349_vm3, %v1688_v30, 0.0  ;;  %v254_v35 = vsel %vm253_vm5, %v1688_v30, 0.0  ;;  %v446_v36 = vsel %vm445_vm6, %v1688_v30, 0.0 }
 0x1af   :  { %v196_v33 = vpack.c.bf16 %v195_v31, %v195_v31  ;;  %v351_v34 = vpack.c.bf16 %v350_v32, %v350_v32  ;;  %v255_v37 = vpack.c.bf16 %v254_v35, %v254_v35  ;;  %v447_v38 = vpack.c.bf16 %v446_v36, %v446_v36 }
 0x1b0   :  { %v302_v39 = vsel %vm301_vm7, %v1688_v30, 0.0  ;;  %v542_v40 = vsel %vm541_vm8, %v1688_v30, 0.0  ;;  %v398_v44 = vsel %vm397_vm9, %v1688_v30, 0.0  ;;  %v494_v48 = vsel %vm493_vm10, %v1688_v30, 0.0 }
 0x1b1   :  { %1237 = vmatmul.mubr.msk.bf16.vlgmr.msra.gmra.mrb[0].mxu1 %vm209_vm4, %v196_v33  ;;  %1261 = vmatmul.mubr.msk.bf16.vlgmr.msra.gmra.mrb[4].mxu0 %vm209_vm4, %v351_v34  ;;  %v303_v41 = vpack.c.bf16 %v302_v39, %v302_v39  ;;  %v543_v42 = vpack.c.bf16 %v542_v40, %v542_v40  ;;  %v1740_v43 = vpop.permute.xlu0 %593  ;;  %v399_v46 = vpack.c.bf16 %v398_v44, %v398_v44 }
 0x1b2   :  { %1241 = vmatpush3.bf16.msra.mxu1 %v1664_v21  ;;  %1273 = vmatpush3.bf16.msra.mxu0 %v1664_v21  ;;  %v648_v45 = vsel %vm253_vm5, %v1740_v43, 0.0  ;;  %v752_v49 = vsel %vm349_vm3, %v1740_v43, 0.0  ;;  %v495_v50 = vpack.c.bf16 %v494_v48, %v494_v48  ;;  %v596_v52 = vsel %vm190_vm2, %v1740_v43, 0.0 }
 0x1b3   :  { %1242 = vmatprep.subr.bf16.mxu1 %v1556_v1  ;;  %1274 = vmatprep.subr.bf16.mxu0 %v1556_v1  ;;  %v649_v47 = vpack.c.bf16 %v648_v45, %v648_v45  ;;  %v753_v51 = vpack.c.bf16 %v752_v49, %v752_v49  ;;  %v856_v53 = vsel %vm445_vm6, %v1740_v43, 0.0  ;;  %v597_v54 = vpack.c.bf16 %v596_v52, %v596_v52 }
 0x1b4   :  { %1244 = vmatprep.mubr.msk.bf16.mxu1 %vm1555_vm0, %v1556_v1  ;;  %1276 = vmatprep.mubr.msk.bf16.mxu0 %vm1555_vm0, %v1556_v1  ;;  %v857_v55 = vpack.c.bf16 %v856_v53, %v856_v53  ;;  %v700_v56 = vsel %vm301_vm7, %v1740_v43, 0.0  ;;  %v960_v57 = vsel %vm541_vm8, %v1740_v43, 0.0  ;;  %v804_v60 = vsel %vm397_vm9, %v1740_v43, 0.0 }
 0x1b5   :  { %v701_v58 = vpack.c.bf16 %v700_v56, %v700_v56  ;;  %v961_v59 = vpack.c.bf16 %v960_v57, %v960_v57  ;;  %v805_v61 = vpack.c.bf16 %v804_v60, %v804_v60  ;;  %v908_v62 = vsel %vm493_vm10, %v1740_v43, 0.0 }
 0x1b6   :  { %1243 = vmatpush3.bf16.msra.mxu1 %v1668_v22  ;;  %1275 = vmatpush3.bf16.msra.mxu0 %v1668_v22  ;;  %v909_v63 = vpack.c.bf16 %v908_v62, %v908_v62 }
 0x1b7   :  { %1248 = vmatprep.subr.bf16.mxu1 %v1556_v1  ;;  %1288 = vmatprep.subr.bf16.mxu0 %v1556_v1 }
 0x1b9   :  { %1245 = vmatmul.mubr.msk.bf16.vlgmr.msra.gmra.mrb[4].mxu1 %vm209_vm4, %v255_v37  ;;  %1277 = vmatmul.mubr.msk.bf16.vlgmr.msra.gmra.mrb[8].mxu0 %vm209_vm4, %v447_v38 }
 0x1ba   :  { %1249 = vmatpush3.bf16.msra.mxu1 %v1664_v21  ;;  %1289 = vmatpush3.bf16.msra.mxu0 %v1664_v21 }
 0x1bb   :  { %1250 = vmatprep.subr.bf16.mxu1 %v1556_v1  ;;  %1290 = vmatprep.subr.bf16.mxu0 %v1556_v1 }
 0x1bc   :  { %1252 = vmatprep.mubr.msk.bf16.mxu1 %vm1555_vm0, %v1556_v1  ;;  %1292 = vmatprep.mubr.msk.bf16.mxu0 %vm1555_vm0, %v1556_v1 }
 0x1be   :  { %1251 = vmatpush3.bf16.msra.mxu1 %v1668_v22  ;;  %1291 = vmatpush3.bf16.msra.mxu0 %v1668_v22 }
 0x1bf   :  { %1264 = vmatprep.subr.bf16.mxu1 %v1556_v1  ;;  %1304 = vmatprep.subr.bf16.mxu0 %v1556_v1 }
 0x1c1   :  { %1253 = vmatmul.mubr.msk.bf16.vlgmr.msra.gmra.mrb[8].mxu1 %vm209_vm4, %v303_v41  ;;  %1293 = vmatmul.mubr.msk.bf16.vlgmr.msra.gmra.mrb[12].mxu0 %vm209_vm4, %v543_v42 }
 0x1c2   :  { %1265 = vmatpush3.bf16.msra.mxu1 %v1664_v21  ;;  %1305 = vmatpush3.bf16.msra.mxu0 %v1664_v21 }
 0x1c3   :  { %1266 = vmatprep.subr.bf16.mxu1 %v1556_v1  ;;  %1306 = vmatprep.subr.bf16.mxu0 %v1556_v1 }
 0x1c4   :  { %1268 = vmatprep.mubr.msk.bf16.mxu1 %vm1555_vm0, %v1556_v1  ;;  %1308 = vmatprep.mubr.msk.bf16.mxu0 %vm1555_vm0, %v1556_v1 }
 0x1c6   :  { %1267 = vmatpush3.bf16.msra.mxu1 %v1668_v22  ;;  %1307 = vmatpush3.bf16.msra.mxu0 %v1668_v22 }
 0x1c7   :  { %1280 = vmatprep.subr.bf16.mxu1 %v1556_v1  ;;  %1320 = vmatprep.subr.bf16.mxu0 %v1556_v1 }
 0x1c9   :  { %1269 = vmatmul.mubr.msk.bf16.vlgmr.msra.gmra.mrb[12].mxu1 %vm209_vm4, %v399_v46  ;;  %1309 = vmatmul.mubr.msk.bf16.vlgmr.msra.gmra.mrb[16].mxu0 %vm209_vm4, %v649_v47 }
 0x1ca   :  { %1281 = vmatpush3.bf16.msra.mxu1 %v1664_v21  ;;  %1321 = vmatpush3.bf16.msra.mxu0 %v1664_v21 }
 0x1cb   :  { %1282 = vmatprep.subr.bf16.mxu1 %v1556_v1  ;;  %1322 = vmatprep.subr.bf16.mxu0 %v1556_v1 }
 0x1cc   :  { %1284 = vmatprep.mubr.msk.bf16.mxu1 %vm1555_vm0, %v1556_v1  ;;  %1324 = vmatprep.mubr.msk.bf16.mxu0 %vm1555_vm0, %v1556_v1 }
 0x1ce   :  { %1283 = vmatpush3.bf16.msra.mxu1 %v1668_v22  ;;  %1323 = vmatpush3.bf16.msra.mxu0 %v1668_v22 }
 0x1cf   :  { %1296 = vmatprep.subr.bf16.mxu1 %v1556_v1  ;;  %1336 = vmatprep.subr.bf16.mxu0 %v1556_v1 }
 0x1d1   :  { %1285 = vmatmul.mubr.msk.bf16.vlgmr.msra.gmra.mrb[16].mxu1 %vm209_vm4, %v495_v50  ;;  %1325 = vmatmul.mubr.msk.bf16.vlgmr.msra.gmra.mrb[20].mxu0 %vm209_vm4, %v753_v51 }
 0x1d2   :  { %1297 = vmatpush3.bf16.msra.mxu1 %v1664_v21  ;;  %1337 = vmatpush3.bf16.msra.mxu0 %v1664_v21 }
 0x1d3   :  { %1298 = vmatprep.subr.bf16.mxu1 %v1556_v1  ;;  %1338 = vmatprep.subr.bf16.mxu0 %v1556_v1 }
 0x1d4   :  { %1300 = vmatprep.mubr.msk.bf16.mxu1 %vm1555_vm0, %v1556_v1  ;;  %1340 = vmatprep.mubr.msk.bf16.mxu0 %vm1555_vm0, %v1556_v1 }
 0x1d6   :  { %1299 = vmatpush3.bf16.msra.mxu1 %v1668_v22  ;;  %1339 = vmatpush3.bf16.msra.mxu0 %v1668_v22 }
 0x1d7   :  { %1312 = vmatprep.subr.bf16.mxu1 %v1556_v1  ;;  %1352 = vmatprep.subr.bf16.mxu0 %v1556_v1 }
 0x1d9   :  { %1301 = vmatmul.mubr.msk.bf16.vlgmr.msra.gmra.mrb[20].mxu1 %vm209_vm4, %v597_v54  ;;  %1341 = vmatmul.mubr.msk.bf16.vlgmr.msra.gmra.mrb[24].mxu0 %vm209_vm4, %v857_v55 }
 0x1da   :  { %1313 = vmatpush3.bf16.msra.mxu1 %v1664_v21  ;;  %1353 = vmatpush3.bf16.msra.mxu0 %v1664_v21 }
 0x1db   :  { %1314 = vmatprep.subr.bf16.mxu1 %v1556_v1  ;;  %1354 = vmatprep.subr.bf16.mxu0 %v1556_v1 }
 0x1dc   :  { %1316 = vmatprep.mubr.msk.bf16.mxu1 %vm1555_vm0, %v1556_v1  ;;  %1356 = vmatprep.mubr.msk.bf16.mxu0 %vm1555_vm0, %v1556_v1 }
 0x1de   :  { %1315 = vmatpush3.bf16.msra.mxu1 %v1668_v22  ;;  %1355 = vmatpush3.bf16.msra.mxu0 %v1668_v22 }
 0x1df   :  { %1328 = vmatprep.subr.bf16.mxu1 %v1556_v1 }
 0x1e1   :  { %1317 = vmatmul.mubr.msk.bf16.vlgmr.msra.gmra.mrb[24].mxu1 %vm209_vm4, %v701_v58  ;;  %1357 = vmatmul.mubr.msk.bf16.vlgmr.msra.gmra.mrb[28].mxu0 %vm209_vm4, %v961_v59 }
 0x1e2   :  { %1329 = vmatpush3.bf16.msra.mxu1 %v1664_v21  ;;  %1332 = vmatprep.mubr.msk.bf16.mxu1 %vm1555_vm0, %v1556_v1 }
 0x1e3   :  { %1330 = vmatprep.subr.bf16.mxu1 %v1556_v1 }
 0x1e6   :  { %1331 = vmatpush3.bf16.msra.mxu1 %v1668_v22 }
 0x1e7   :  { %1344 = vmatprep.subr.bf16.mxu1 %v1556_v1 }
 0x1e9   :  { %1333 = vmatmul.mubr.msk.bf16.vlgmr.msra.gmra.mrb[28].mxu1 %vm209_vm4, %v805_v61 }
 0x1ea   :  { %1345 = vmatpush3.bf16.msra.mxu1 %v1664_v21  ;;  %1348 = vmatprep.mubr.msk.bf16.mxu1 %vm1555_vm0, %v1556_v1 }
 0x1eb   :  { %1346 = vmatprep.subr.bf16.mxu1 %v1556_v1 }
 0x1ee   :  { %1347 = vmatpush3.bf16.msra.mxu1 %v1668_v22 }
 0x1ef   :  { %1389 = vmatprep.subr.bf16.mxu1 %v1554_v0 }
 0x1f1   :  { %1349 = vmatmul.mubr.msk.bf16.vlgmr.msra.gmra.mrb[32].mxu1 %vm209_vm4, %v909_v63 }
 0x1f2   :  { %1368 = vmatprep.mubr.msk.f32.mxu1 %vm1555_vm0, %v1556_v1  ;;  %1391 = vmatpush3.bf16.msra.mxu1 %v1390_v4 }
 0x1f3   :  { %1392 = vmatprep.subr.bf16.mxu1 %v1554_v0 }
 0x1f6   :  { %1394 = vmatpush3.bf16.msra.mxu1 %v1393_v7 }
 0x284   :  { %v247_v8 = vpop.f32.mrb[0].mxu1  ;;  %v389_v9 = vpop.f32.mrb[4].mxu0 }
 0x285   :  { %v1238_v10 = vpop.f32.mrb[1].mxu1  ;;  %v1262_v11 = vpop.f32.mrb[5].mxu0  ;;  %v641_v61 = vmul.f32 %v247_v8, %v1679_v25  ;;  %v797_v2 = vmul.f32 %v389_v9, %v1679_v25 }
 0x286   :  { %v250_v12 = vpop.f32.mrb[2].mxu1  ;;  %v392_v13 = vpop.f32.mrb[6].mxu0 }
 0x287   :  { %v1239_v14 = vpop.f32.mrb[3].mxu1  ;;  %v1263_v15 = vpop.f32.mrb[7].mxu0 }
 0x28c   :  { %v293_v16 = vpop.f32.mrb[4].mxu1  ;;  %v485_v1 = vpop.f32.mrb[8].mxu0 }
 0x28d   :  { %v299_v17 = vmax.f32 %v247_v8, %v293_v16  ;;  %v300_v18 = vmin.f32 %v247_v8, %v293_v16  ;;  %v1246_v19 = vpop.f32.mrb[5].mxu1  ;;  %v1278_v20 = vpop.f32.mrb[9].mxu0  ;;  %v693_v3 = vmul.f32 %v293_v16, %v1679_v25  ;;  %v901_v4 = vmul.f32 %v485_v1, %v1679_v25 }
 0x28e   :  { %v296_v21 = vpop.f32.mrb[6].mxu1  ;;  %v488_v0 = vpop.f32.mrb[10].mxu0 }
 0x28f   :  { %v1247_v22 = vpop.f32.mrb[7].mxu1  ;;  %v1279_v23 = vpop.f32.mrb[11].mxu0 }
 0x294   :  { %v341_v24 = vpop.f32.mrb[8].mxu1  ;;  %v581_v26 = vpop.f32.mrb[12].mxu0 }
 0x295   :  { %v347_v27 = vmax.f32 %v299_v17, %v341_v24  ;;  %v348_v28 = vmin.f32 %v300_v18, %v341_v24  ;;  %v1254_v29 = vpop.f32.mrb[9].mxu1  ;;  %v1294_v30 = vpop.f32.mrb[13].mxu0  ;;  %v745_v6 = vmul.f32 %v341_v24, %v1679_v25  ;;  %v1005_v7 = vmul.f32 %v581_v26, %v1679_v25 }
 0x296   :  { %v344_v31 = vpop.f32.mrb[10].mxu1  ;;  %v584_v32 = vpop.f32.mrb[14].mxu0 }
 0x297   :  { %v1255_v33 = vpop.f32.mrb[11].mxu1  ;;  %v1295_v34 = vpop.f32.mrb[15].mxu0  ;;  %v395_v35 = vmax.f32 %v347_v27, %v389_v9  ;;  %v396_v36 = vmin.f32 %v348_v28, %v389_v9 }
 0x29c   :  { %v437_v37 = vpop.f32.mrb[12].mxu1  ;;  %v1848_v38 = vpop.f32.mrb[16].mxu0 }
 0x29d   :  { %v443_v39 = vmax.f32 %v395_v35, %v437_v37  ;;  %v444_v40 = vmin.f32 %v396_v36, %v437_v37  ;;  %v1270_v41 = vpop.f32.mrb[13].mxu1  ;;  %v1310_v42 = vpop.f32.mrb[17].mxu0  ;;  %v849_v8 = vmul.f32 %v437_v37, %v1679_v25 }
 0x29e   :  { %v440_v43 = vpop.f32.mrb[14].mxu1  ;;  %v690_v44 = vpop.f32.mrb[18].mxu0 }
 0x29f   :  { %v1271_v45 = vpop.f32.mrb[15].mxu1  ;;  %v1311_v46 = vpop.f32.mrb[19].mxu0  ;;  %v491_v47 = vmax.f32 %v443_v39, %v485_v1  ;;  %v492_v48 = vmin.f32 %v444_v40, %v485_v1 }
 0x2a4   :  { %v533_v49 = vpop.f32.mrb[16].mxu1  ;;  %v1850_v50 = vpop.f32.mrb[20].mxu0 }
 0x2a5   :  { %v539_v51 = vmax.f32 %v491_v47, %v533_v49  ;;  %v540_v52 = vmin.f32 %v492_v48, %v533_v49  ;;  %v1286_v53 = vpop.f32.mrb[17].mxu1  ;;  %v1326_v54 = vpop.f32.mrb[21].mxu0  ;;  %v953_v5 = vmul.f32 %v533_v49, %v1679_v25 }
 0x2a6   :  { %v536_v55 = vpop.f32.mrb[18].mxu1  ;;  %v794_v56 = vpop.f32.mrb[22].mxu0 }
 0x2a7   :  { %v587_v57 = vmax.f32 %v539_v51, %v581_v26  ;;  %v588_v58 = vmin.f32 %v540_v52, %v581_v26  ;;  %v1287_v59 = vpop.f32.mrb[19].mxu1  ;;  %v1327_v60 = vpop.f32.mrb[23].mxu0 }
 0x2a9   :  { %v590_v62 = vmul.f32 %v587_v57, %v1679_v25  ;;  %v591_v63 = vmul.f32 %v588_v58, %v1679_v25 }
 0x2ab   :  { %v592_v10 = vsel %vm589_vm11, %v590_v62, %v591_v63 }
 0x2ac   :  { %v954_v11 = vsub.f32 %v953_v5, %v592_v10  ;;  %v798_v12 = vsub.f32 %v797_v2, %v592_v10  ;;  %v635_v13 = vpop.f32.mrb[20].mxu1  ;;  %v642_v14 = vsub.f32 %v641_v61, %v592_v10  ;;  %v694_v15 = vsub.f32 %v693_v3, %v592_v10  ;;  %v895_v17 = vpop.f32.mrb[24].mxu0 }
 0x2ad   :  { %v902_v9 = vsub.f32 %v901_v4, %v592_v10  ;;  %v1302_v18 = vpop.f32.mrb[21].mxu1  ;;  %v1342_v16 = vpop.f32.mrb[25].mxu0  ;;  %v746_v19 = vsub.f32 %v745_v6, %v592_v10  ;;  %v1006_v1 = vsub.f32 %v1005_v7, %v592_v10  ;;  %v850_v20 = vsub.f32 %v849_v8, %v592_v10 }
 0x2ae   :  { %v799_v21 = vmul.f32 1.442695, %v798_v12  ;;  %v643_v0 = vmul.f32 1.442695, %v642_v14  ;;  %v695_v22 = vmul.f32 1.442695, %v694_v15 }
 0x2af   :  { %v638_v23 = vpop.f32.mrb[22].mxu1  ;;  %v898_v24 = vpop.f32.mrb[26].mxu0  ;;  %v903_v26 = vmul.f32 1.442695, %v902_v9  ;;  %v747_v28 = vmul.f32 1.442695, %v746_v19 }
 0x2b0   :  { %v1303_v25 = vpop.f32.mrb[23].mxu1  ;;  %v1343_v27 = vpop.f32.mrb[27].mxu0  ;;  %1410 = vpow2.f32 %v799_v21  ;;  %v1007_v29 = vmul.f32 1.442695, %v1006_v1  ;;  %v851_v30 = vmul.f32 1.442695, %v850_v20 }
 0x2b1   :  { %1412 = vpow2.f32 %v643_v0  ;;  %v955_v35 = vmul.f32 1.442695, %v954_v11  ;;  %v1137_v16 = vld [vmem:[%s1886_s5] ss:$0 sm:$0xff] }
 0x2b2   :  { %1414 = vpow2.f32 %v695_v22 }
 0x2b3   :  { %1416 = vpow2.f32 %v903_v26 }
 0x2b4   :  { %v739_v31 = vpop.f32.mrb[24].mxu1  ;;  %v999_v32 = vpop.f32.mrb[28].mxu0  ;;  %1418 = vpow2.f32 %v747_v28 }
 0x2b5   :  { %v1318_v33 = vpop.f32.mrb[25].mxu1  ;;  %v1358_v34 = vpop.f32.mrb[29].mxu0  ;;  %1420 = vpow2.f32 %v1007_v29 }
 0x2b6   :  { %v742_v36 = vpop.f32.mrb[26].mxu1  ;;  %v1002_v37 = vpop.f32.mrb[30].mxu0  ;;  %1422 = vpow2.f32 %v851_v30 }
 0x2b7   :  { %v1319_v39 = vpop.f32.mrb[27].mxu1  ;;  %v1359_v40 = vpop.f32.mrb[31].mxu0  ;;  %1424 = vpow2.f32 %v955_v35 }
 0x2ba   :  { %v1411_v41 = vpop.eup %1410 }
 0x2bb   :  { %v1413_v42 = vpop.eup %1412  ;;  %v802_v43 = vmul.f32 %v1411_v41, %v1850_v50 }
 0x2bc   :  { %v843_v44 = vpop.f32.mrb[28].mxu1  ;;  %v1415_v45 = vpop.eup %1414  ;;  %v646_v46 = vmul.f32 %v1413_v42, %v635_v13 }
 0x2bd   :  { %v1334_v47 = vpop.f32.mrb[29].mxu1  ;;  %v1417_v48 = vpop.eup %1416  ;;  %v697_v49 = vadd.f32 %v1415_v45, %v1413_v42  ;;  %v698_v51 = vmul.f32 %v1415_v45, %v1848_v38 }
 0x2be   :  { %v846_v52 = vpop.f32.mrb[30].mxu1  ;;  %v1419_v53 = vpop.eup %1418  ;;  %v906_v54 = vmul.f32 %v1417_v48, %v895_v17 }
 0x2bf   :  { %v1335_v55 = vpop.f32.mrb[31].mxu1  ;;  %v1421_v56 = vpop.eup %1420  ;;  %v699_v57 = vadd.f32 %v698_v51, %v646_v46  ;;  %v749_v58 = vadd.f32 %v1419_v53, %v697_v49  ;;  %v750_v59 = vmul.f32 %v1419_v53, %v739_v31 }
 0x2c0   :  { %v1423_v60 = vpop.eup %1422  ;;  %v1010_v61 = vmul.f32 %v1421_v56, %v999_v32 }
 0x2c1   :  { %v751_v62 = vadd.f32 %v750_v59, %v699_v57  ;;  %v801_v50 = vadd.f32 %v1411_v41, %v749_v58  ;;  %v854_v63 = vmul.f32 %v1423_v60, %v843_v44  ;;  %v1425_v2 = vpop.eup %1424 }
 0x2c3   :  { %v803_v3 = vadd.f32 %v802_v43, %v751_v62  ;;  %v853_v4 = vadd.f32 %v1423_v60, %v801_v50 }
 0x2c4   :  { %v947_v5 = vpop.f32.mrb[32].mxu1 }
 0x2c5   :  { %v958_v6 = vmul.f32 %v1425_v2, %v947_v5  ;;  %v1350_v7 = vpop.f32.mrb[33].mxu1  ;;  %v855_v38 = vadd.f32 %v854_v63, %v803_v3  ;;  %v905_v8 = vadd.f32 %v1417_v48, %v853_v4 }
 0x2c6   :  { %v950_v10 = vpop.f32.mrb[34].mxu1 }
 0x2c7   :  { %v1351_v11 = vpop.f32.mrb[35].mxu1  ;;  %v907_v12 = vadd.f32 %v906_v54, %v855_v38  ;;  %v957_v13 = vadd.f32 %v1425_v2, %v905_v8 }
 0x2c9   :  { %v959_v14 = vadd.f32 %v958_v6, %v907_v12  ;;  %v1009_v15 = vadd.f32 %v1421_v56, %v957_v13 }
 0x2cb   :  { %v1011_v17 = vadd.f32 %v1010_v61, %v959_v14  ;;  %1426 = vrcp.f32 %v1009_v15 }
 0x2d5   :  { %v1427_v9 = vpop.eup %1426 }
 0x2d6   :  { %v1013_v18 = vmul.f32 %v1427_v9, %v1011_v17 }
 0x2d8   :  { %1369 = vmatmul.mubr.msk.f32.vlgmr.msra.gmra.mrb[36].mxu1 %vm209_vm4, %v1013_v18 }
 0x3ab   :  { %v1094_v19 = vpop.f32.mrb[36].mxu1 }
 0x3ac   :  { %v1095_v1 = vadd.f32 %v1137_v16, %v1094_v19  ;;  %v1370_v20 = vpop.f32.mrb[37].mxu1 }
 0x3ae   :  { %1099 = vst.msk [vmem:[#allocation10] sm:$0xf] %vm1098_vm12, %v1095_v1 }
 0x3af   :  { %1527 = shalt.err (!%p1524_p8)
}
 0x3b0   :  { %s1528_s29 = scalar_lea.hbm %s1887_s6, 64 }
 0x3b1   :  { %p1529_p9 = scmp.ne.s32.totalorder %s1887_s6, %s1528_s29  ;;  %p1532_p10 = scmp.lt.u32.totalorder %s1528_s29, %s1887_s6 }
 0x3b3   :  { %p1534_p11 = pnand %p1532_p10, %p1529_p9 }
 0x3b5   :  { %1537 = shalt.err (!%p1534_p11)
}
 0x3b6   :  { %1109 = dma.vmem_to_hbm [thread:$0]  %s1107_s25, 64, %s1887_s6, [#allocation4]  }
 0x3b7   :  { %1544 = dma.done.wait [#allocation4], 64  }
 0x3b8   :  { %1545 = vsyncadd [#allocation4], 4294967232 }
 0x3b9   :  { %1113 = vsyncpa [#allocation3], 1 }
 0x3ba   :  { %1114 = vsyncpa [#allocation6], 1 }
 0x3bb   :  { %1115 = vsyncpa [#allocation9], 1 }
 0x3bc   :  { %1116 = vsyncpa [#allocation4], 1 }

// kernel: tpu_custom_call.1
= control target key start
LH: loop header
LB: loop body
LE: loop exit
PB: predicated region body
PF: predicated region fallthrough
CT: control target
= control target key end

     0   :  { %11 = vsyncpa [#allocation3], 0  ;;  %s1881_s0 = inlined_call_operand.hbm [shape: f32[4,96], index: 0, kind: input, shape index: {}]   ;;  %s1882_s1 = inlined_call_operand.hbm [shape: f32[96,96], index: 1, kind: input, shape index: {}]   ;;  %s1883_s2 = inlined_call_operand.vmem [shape: f32[1,96], index: 2, kind: input, shape index: {}]   ;;  %s1884_s3 = inlined_call_operand.hbm [shape: bf16[32,32], index: 3, kind: input, shape index: {}]   ;;  %s1885_s4 = inlined_call_operand.hbm [shape: f32[32,32], index: 4, kind: input, shape index: {}]   ;;  %s1886_s5 = inlined_call_operand.vmem [shape: f32[1,32], index: 5, kind: input, shape index: {}]   ;;  %s1887_s6 = inlined_call_operand.hbm [shape: f32[4,32], index: 6, kind: output, shape index: {}]  }
   0x1   :  { %12 = vsyncpa [#allocation6], 0 }
   0x2   :  { %13 = vsyncpa [#allocation9], 0 }
   0x3   :  { %14 = vsyncpa [#allocation4], 0  ;;  %s1546_s21 = smov [#allocation5]   ;;  %s1428_s25 = scalar_lea.hbm %s1882_s1, 1536 }
   0x4   :  { %s30_s22 = sshll.u32 %s1546_s21, 4  ;;  %p1429_p0 = scmp.ne.s32.totalorder %s1882_s1, %s1428_s25  ;;  %s31_s22 = int_to_ptr.vmem [resolvable:$true] %s30_s22 }
   0x5   :  { %p1432_p1 = scmp.lt.u32.totalorder %s1428_s25, %s1882_s1 }
   0x7   :  { %p1434_p2 = pnand %p1432_p1, %p1429_p0 }
   0x9   :  { %1437 = shalt.err (!%p1434_p2)
}
   0xa   :  { %s1438_s30 = scalar_lea.vmem %s31_s22, 1536  ;;  %p1443_p4 = scmp.lt.s32.totalorder %s31_s22, %s31_s22 }
   0xb   :  { %p1439_p3 = scmp.ne.s32.totalorder %s31_s22, %s1438_s30  ;;  %p1444_p5 = scmp.lt.s32.totalorder %s1438_s30, %s1438_s30 }
   0xd   :  { %p1445_p6 = por %p1444_p5, %p1443_p4 }
   0xf   :  { %p1446_p7 = pnand %p1445_p6, %p1439_p3 }
  0x11   :  { %1449 = shalt.err (!%p1446_p7)
}
  0x12   :  { %s1547_s7 = smov 128   ;;  %s1548_s8 = smov 8  }
  0x13   :  { %36 = dma.hbm_to_vmem [thread:$0]  %s1882_s1, 1536, %s31_s22, [#allocation6], %s1547_s7, %s1547_s7, %s1548_s8  }
  0x14   :  { %s1549_s11 = smov [#allocation2]   ;;  %s1550_s13 = smov [#allocation7]  }
  0x15   :  { %s21_s12 = sshll.u32 %s1549_s11, 4  ;;  %s44_s14 = sshll.u32 %s1550_s13, 4  ;;  %s22_s12 = int_to_ptr.vmem [resolvable:$true] %s21_s12  ;;  %s45_s14 = int_to_ptr.vmem [resolvable:$true] %s44_s14 }
  0x16   :  { %s1450_s17 = scalar_lea.hbm %s1881_s0, 64 }
  0x17   :  { %p1451_p8 = scmp.ne.s32.totalorder %s1881_s0, %s1450_s17  ;;  %p1454_p9 = scmp.lt.u32.totalorder %s1450_s17, %s1881_s0 }
  0x19   :  { %p1456_p10 = pnand %p1454_p9, %p1451_p8 }
  0x1b   :  { %1459 = shalt.err (!%p1456_p10)
}
  0x1c   :  { %s1460_s1 = scalar_lea.vmem %s22_s12, 64  ;;  %p1465_p12 = scmp.lt.s32.totalorder %s22_s12, %s22_s12 }
  0x1d   :  { %p1461_p11 = scmp.ne.s32.totalorder %s22_s12, %s1460_s1  ;;  %p1466_p13 = scmp.lt.s32.totalorder %s1460_s1, %s1460_s1 }
  0x1f   :  { %p1467_p0 = por %p1466_p13, %p1465_p12 }
  0x21   :  { %p1468_p1 = pnand %p1467_p0, %p1461_p11 }
  0x23   :  { %1471 = shalt.err (!%p1468_p1)
}
  0x24   :  { %24 = dma.hbm_to_vmem [thread:$0]  %s1881_s0, 64, %s22_s12, [#allocation3]  }
  0x25   :  { %s1472_s26 = scalar_lea.hbm %s1884_s3, 256 }
  0x26   :  { %p1473_p2 = scmp.ne.s32.totalorder %s1884_s3, %s1472_s26  ;;  %p1476_p3 = scmp.lt.u32.totalorder %s1472_s26, %s1884_s3 }
  0x28   :  { %p1478_p4 = pnand %p1476_p3, %p1473_p2 }
  0x2a   :  { %1481 = shalt.err (!%p1478_p4)
}
  0x2b   :  { %s1482_s9 = scalar_lea.vmem %s45_s14, 256  ;;  %p1487_p6 = scmp.lt.s32.totalorder %s45_s14, %s45_s14 }
  0x2c   :  { %p1483_p5 = scmp.ne.s32.totalorder %s45_s14, %s1482_s9  ;;  %p1488_p7 = scmp.lt.s32.totalorder %s1482_s9, %s1482_s9 }
  0x2e   :  { %p1489_p8 = por %p1488_p7, %p1487_p6 }
  0x30   :  { %p1490_p9 = pnand %p1489_p8, %p1483_p5 }
  0x32   :  { %1493 = shalt.err (!%p1490_p9)
}
  0x33   :  { %s1551_s0 = smov 64   ;;  %s1552_s10 = smov 4  }
  0x34   :  { %50 = dma.hbm_to_vmem [thread:$0]  %s1884_s3, 256, %s45_s14, [#allocation6], %s1551_s0, %s1551_s0, %s1552_s10  }
  0x35   :  { %s1553_s13 = smov [#allocation8]   ;;  %s1494_s18 = scalar_lea.hbm %s1885_s4, 512 }
  0x36   :  { %s56_s15 = sshll.u32 %s1553_s13, 4  ;;  %p1495_p10 = scmp.ne.s32.totalorder %s1885_s4, %s1494_s18  ;;  %s57_s15 = int_to_ptr.vmem [resolvable:$true] %s56_s15 }
  0x37   :  { %p1498_p11 = scmp.lt.u32.totalorder %s1494_s18, %s1885_s4 }
  0x39   :  { %p1500_p12 = pnand %p1498_p11, %p1495_p10 }
  0x3b   :  { %1503 = shalt.err (!%p1500_p12)
}
  0x3c   :  { %s1504_s22 = scalar_lea.vmem %s57_s15, 512  ;;  %p1509_p0 = scmp.lt.s32.totalorder %s57_s15, %s57_s15 }
  0x3d   :  { %p1505_p13 = scmp.ne.s32.totalorder %s57_s15, %s1504_s22  ;;  %p1510_p1 = scmp.lt.s32.totalorder %s1504_s22, %s1504_s22 }
  0x3f   :  { %p1511_p2 = por %p1510_p1, %p1509_p0 }
  0x41   :  { %p1512_p3 = pnand %p1511_p2, %p1505_p13 }
  0x43   :  { %1515 = shalt.err (!%p1512_p3)
}
  0x44   :  { %62 = dma.hbm_to_vmem [thread:$0]  %s1885_s4, 512, %s57_s15, [#allocation9], %s1547_s7, %s1547_s7, %s1548_s8  }
  0x45   :  { %1538 = dma.done.wait [#allocation3], 64  }
  0x46   :  { %1539 = vsyncadd [#allocation3], 4294967232 }
  0x47   :  { %1540 = dma.done.wait [#allocation6], 1792  }
  0x48   :  { %1541 = vsyncadd [#allocation6], 4294965504 }
  0x49   :  { %1542 = dma.done.wait [#allocation9], 512  }
  0x4a   :  { %1543 = vsyncadd [#allocation9], 4294966784  ;;  %v1554_v0 = vmov 0.0|0.0   ;;  %vm1555_vm0 = vmmov 0   ;;  %v1556_v1 = vmov 0.0   ;;  %v79_v2 = vld [vmem:[#allocation5] sm:$0xff]  ;;  %v172_v27 = vlaneseq }
  0x4b   :  { %1371 = vmatprep.subr.bf16.mxu0 %v1554_v0  ;;  %1229 = vmatprep.mubr.msk.f32.mxu0 %vm1555_vm0, %v1556_v1  ;;  %v80_v3 = vld [vmem:[#allocation5 + $0x8] sm:$0xff]  ;;  %v81_v4 = vld [vmem:[#allocation5 + $0x10] sm:$0xff]  ;;  %v82_v6 = vld [vmem:[#allocation5 + $0x18] sm:$0xff]  ;;  %vm98_vm1 = vcmask 785408   ;;  %s1557_s8 = smov 96   ;;  %vm209_vm4 = vcmask 261120  }
  0x4c   :  { %1232 = vmatprep.subr.bf16.mxu1 %v1556_v1  ;;  %1236 = vmatprep.mubr.msk.bf16.mxu1 %vm1555_vm0, %v1556_v1  ;;  %v1372_v5 = vpack.c.bf16 %v80_v3, %v79_v2  ;;  %v1375_v7 = vpack.c.bf16 %v82_v6, %v81_v4  ;;  %v83_v8 = vld [vmem:[#allocation5 + $0x20] sm:$0xff]  ;;  %v84_v9 = vld [vmem:[#allocation5 + $0x28] sm:$0xff]  ;;  %v85_v11 = vld [vmem:[#allocation5 + $0x30] sm:$0xff]  ;;  %v173_v28 = vand.u32 127, %v172_v27  ;;  %s1558_s24 = smov [#allocation10]   ;;  %vm1098_vm12 = vcmask 257024  }
  0x4d   :  { %v1378_v10 = vpack.c.bf16 %v84_v9, %v83_v8  ;;  %v86_v12 = vld [vmem:[#allocation5 + $0x38] sm:$0xff]  ;;  %v87_v14 = vld [vmem:[#allocation5 + $0x40] sm:$0xff]  ;;  %v88_v15 = vld [vmem:[#allocation5 + $0x48] sm:$0xff]  ;;  %s1106_s25 = sshll.u32 %s1558_s24, 4  ;;  %s1107_s25 = int_to_ptr.vmem [resolvable:$true] %s1106_s25 }
  0x4e   :  { %1373 = vmatpush3.bf16.msra.mxu0 %v1372_v5  ;;  %v1381_v13 = vpack.c.bf16 %v86_v12, %v85_v11  ;;  %v1384_v16 = vpack.c.bf16 %v88_v15, %v87_v14  ;;  %v89_v17 = vld [vmem:[#allocation5 + $0x50] sm:$0xff]  ;;  %v90_v18 = vld [vmem:[#allocation5 + $0x58] sm:$0xff]  ;;  %v1664_v21 = vld [vmem:[#allocation7] sm:$0xff]   ;;  %v1684_v29 = vand.u32 7, %v173_v28  ;;  %s1516_s26 = scalar_lea.vmem %s1107_s25, 64  ;;  %p1521_p5 = scmp.lt.s32.totalorder %s1107_s25, %s1107_s25 }
  0x4f   :  { %1374 = vmatprep.subr.bf16.mxu0 %v1554_v0  ;;  %v1387_v19 = vpack.c.bf16 %v90_v18, %v89_v17  ;;  %v78_v20 = vld [vmem:[#allocation2] sm:$0xf]  ;;  %1233 = vmatpush3.bf16.msra.mxu1 %v1664_v21  ;;  %v1668_v22 = vld [vmem:[#allocation7 + $0x8] sm:$0xff]   ;;  %v1014_v2 = vld [vmem:[#allocation8] sm:$0xff]  ;;  %p1517_p4 = scmp.ne.s32.totalorder %s1107_s25, %s1516_s26  ;;  %p1522_p6 = scmp.lt.s32.totalorder %s1516_s26, %s1516_s26 }
  0x50   :  { %1234 = vmatprep.subr.bf16.mxu1 %v1556_v1  ;;  %v1117_v23 = vld [vmem:[%s1883_s2] ss:$0 sm:$0xff]  ;;  %vm190_vm2 = vcmp.eq.s32.totalorder %v1684_v29, 0  ;;  %vm349_vm3 = vcmp.eq.s32.totalorder %v1684_v29, 3  ;;  %vm253_vm5 = vcmp.eq.s32.totalorder %v1684_v29, 1  ;;  %vm445_vm6 = vcmp.eq.s32.totalorder %v1684_v29, 5 }
  0x51   :  { %vm301_vm7 = vcmp.eq.s32.totalorder %v1684_v29, 2  ;;  %vm541_vm8 = vcmp.eq.s32.totalorder %v1684_v29, 7  ;;  %vm397_vm9 = vcmp.eq.s32.totalorder %v1684_v29, 4  ;;  %vm493_vm10 = vcmp.eq.s32.totalorder %v1684_v29, 6  ;;  %v1015_v3 = vld [vmem:[#allocation8 + $0x8] sm:$0xff]  ;;  %v1016_v5 = vld [vmem:[#allocation8 + $0x10] sm:$0xff]  ;;  %p1523_p7 = por %p1522_p6, %p1521_p5 }
  0x52   :  { %1376 = vmatpush3.bf16.msra.mxu0 %v1375_v7  ;;  %v1390_v4 = vpack.c.bf16 %v1015_v3, %v1014_v2  ;;  %v1017_v6 = vld [vmem:[#allocation8 + $0x18] sm:$0xff] }
  0x53   :  { %1377 = vmatprep.subr.bf16.mxu0 %v1554_v0  ;;  %1235 = vmatpush3.bf16.msra.mxu1 %v1668_v22  ;;  %v1393_v7 = vpack.c.bf16 %v1017_v6, %v1016_v5  ;;  %p1524_p8 = pnand %p1523_p7, %p1517_p4 }
  0x54   :  { %1240 = vmatprep.subr.bf16.mxu1 %v1556_v1 }
  0x56   :  { %1379 = vmatpush3.bf16.msra.mxu0 %v1378_v10 }
  0x57   :  { %1380 = vmatprep.subr.bf16.mxu0 %v1554_v0 }
  0x5a   :  { %1382 = vmatpush3.bf16.msra.mxu0 %v1381_v13 }
  0x5b   :  { %1383 = vmatprep.subr.bf16.mxu0 %v1554_v0 }
  0x5e   :  { %1385 = vmatpush3.bf16.msra.mxu0 %v1384_v16 }
  0x5f   :  { %1386 = vmatprep.subr.bf16.mxu0 %v1554_v0 }
  0x62   :  { %1388 = vmatpush3.bf16.msra.mxu0 %v1387_v19 }
  0x63   :  { %1256 = vmatprep.subr.bf16.mxu0 %v1556_v1 }
  0x65   :  { %1230 = vmatmul.mubr.msk.f32.vlgmr.msra.gmra.mrb[0].mxu0 %vm98_vm1, %v78_v20 }
  0x66   :  { %1260 = vmatprep.mubr.msk.bf16.mxu0 %vm1555_vm0, %v1556_v1  ;;  %1257 = vmatpush3.bf16.msra.mxu0 %v1664_v21 }
  0x67   :  { %1258 = vmatprep.subr.bf16.mxu0 %v1556_v1 }
  0x6a   :  { %1259 = vmatpush3.bf16.msra.mxu0 %v1668_v22 }
  0x6b   :  { %1272 = vmatprep.subr.bf16.mxu0 %v1556_v1 }
 0x138   :  { %v168_v24 = vpop.f32.mrb[0].mxu0 }
 0x139   :  { %v1679_v25 = vadd.f32 %v1117_v23, %v168_v24  ;;  %v1231_v26 = vpop.f32.mrb[1].mxu0 }
 0x13b   :  { %192 = vrot.lane.b32.xlu0 %v1679_v25, %s1557_s8  ;;  %vm589_vm11 = vcmp.ge.f32.partialorder %v1679_v25, 0.0 }
 0x13f   :  { %593 = vrot.lane.b32.xlu0 %v1679_v25, %s1551_s0 }
 0x1ad   :  { %v1688_v30 = vpop.permute.xlu0 %192 }
 0x1ae   :  { %v195_v31 = vsel %vm190_vm2, %v1688_v30, 0.0  ;;  %v350_v32 = vsel %vm349_vm3, %v1688_v30, 0.0  ;;  %v254_v35 = vsel %vm253_vm5, %v1688_v30, 0.0  ;;  %v446_v36 = vsel %vm445_vm6, %v1688_v30, 0.0 }
 0x1af   :  { %v196_v33 = vpack.c.bf16 %v195_v31, %v195_v31  ;;  %v351_v34 = vpack.c.bf16 %v350_v32, %v350_v32  ;;  %v255_v37 = vpack.c.bf16 %v254_v35, %v254_v35  ;;  %v447_v38 = vpack.c.bf16 %v446_v36, %v446_v36 }
 0x1b0   :  { %v302_v39 = vsel %vm301_vm7, %v1688_v30, 0.0  ;;  %v542_v40 = vsel %vm541_vm8, %v1688_v30, 0.0  ;;  %v398_v44 = vsel %vm397_vm9, %v1688_v30, 0.0  ;;  %v494_v48 = vsel %vm493_vm10, %v1688_v30, 0.0 }
 0x1b1   :  { %1237 = vmatmul.mubr.msk.bf16.vlgmr.msra.gmra.mrb[0].mxu1 %vm209_vm4, %v196_v33  ;;  %1261 = vmatmul.mubr.msk.bf16.vlgmr.msra.gmra.mrb[4].mxu0 %vm209_vm4, %v351_v34  ;;  %v303_v41 = vpack.c.bf16 %v302_v39, %v302_v39  ;;  %v543_v42 = vpack.c.bf16 %v542_v40, %v542_v40  ;;  %v1740_v43 = vpop.permute.xlu0 %593  ;;  %v399_v46 = vpack.c.bf16 %v398_v44, %v398_v44 }
 0x1b2   :  { %1241 = vmatpush3.bf16.msra.mxu1 %v1664_v21  ;;  %1273 = vmatpush3.bf16.msra.mxu0 %v1664_v21  ;;  %v648_v45 = vsel %vm253_vm5, %v1740_v43, 0.0  ;;  %v752_v49 = vsel %vm349_vm3, %v1740_v43, 0.0  ;;  %v495_v50 = vpack.c.bf16 %v494_v48, %v494_v48  ;;  %v596_v52 = vsel %vm190_vm2, %v1740_v43, 0.0 }
 0x1b3   :  { %1242 = vmatprep.subr.bf16.mxu1 %v1556_v1  ;;  %1274 = vmatprep.subr.bf16.mxu0 %v1556_v1  ;;  %v649_v47 = vpack.c.bf16 %v648_v45, %v648_v45  ;;  %v753_v51 = vpack.c.bf16 %v752_v49, %v752_v49  ;;  %v856_v53 = vsel %vm445_vm6, %v1740_v43, 0.0  ;;  %v597_v54 = vpack.c.bf16 %v596_v52, %v596_v52 }
 0x1b4   :  { %1244 = vmatprep.mubr.msk.bf16.mxu1 %vm1555_vm0, %v1556_v1  ;;  %1276 = vmatprep.mubr.msk.bf16.mxu0 %vm1555_vm0, %v1556_v1  ;;  %v857_v55 = vpack.c.bf16 %v856_v53, %v856_v53  ;;  %v700_v56 = vsel %vm301_vm7, %v1740_v43, 0.0  ;;  %v960_v57 = vsel %vm541_vm8, %v1740_v43, 0.0  ;;  %v804_v60 = vsel %vm397_vm9, %v1740_v43, 0.0 }
 0x1b5   :  { %v701_v58 = vpack.c.bf16 %v700_v56, %v700_v56  ;;  %v961_v59 = vpack.c.bf16 %v960_v57, %v960_v57  ;;  %v805_v61 = vpack.c.bf16 %v804_v60, %v804_v60  ;;  %v908_v62 = vsel %vm493_vm10, %v1740_v43, 0.0 }
 0x1b6   :  { %1243 = vmatpush3.bf16.msra.mxu1 %v1668_v22  ;;  %1275 = vmatpush3.bf16.msra.mxu0 %v1668_v22  ;;  %v909_v63 = vpack.c.bf16 %v908_v62, %v908_v62 }
 0x1b7   :  { %1248 = vmatprep.subr.bf16.mxu1 %v1556_v1  ;;  %1288 = vmatprep.subr.bf16.mxu0 %v1556_v1 }
 0x1b9   :  { %1245 = vmatmul.mubr.msk.bf16.vlgmr.msra.gmra.mrb[4].mxu1 %vm209_vm4, %v255_v37  ;;  %1277 = vmatmul.mubr.msk.bf16.vlgmr.msra.gmra.mrb[8].mxu0 %vm209_vm4, %v447_v38 }
 0x1ba   :  { %1249 = vmatpush3.bf16.msra.mxu1 %v1664_v21  ;;  %1289 = vmatpush3.bf16.msra.mxu0 %v1664_v21 }
 0x1bb   :  { %1250 = vmatprep.subr.bf16.mxu1 %v1556_v1  ;;  %1290 = vmatprep.subr.bf16.mxu0 %v1556_v1 }
 0x1bc   :  { %1252 = vmatprep.mubr.msk.bf16.mxu1 %vm1555_vm0, %v1556_v1  ;;  %1292 = vmatprep.mubr.msk.bf16.mxu0 %vm1555_vm0, %v1556_v1 }
 0x1be   :  { %1251 = vmatpush3.bf16.msra.mxu1 %v1668_v22  ;;  %1291 = vmatpush3.bf16.msra.mxu0 %v1668_v22 }
 0x1bf   :  { %1264 = vmatprep.subr.bf16.mxu1 %v1556_v1  ;;  %1304 = vmatprep.subr.bf16.mxu0 %v1556_v1 }
 0x1c1   :  { %1253 = vmatmul.mubr.msk.bf16.vlgmr.msra.gmra.mrb[8].mxu1 %vm209_vm4, %v303_v41  ;;  %1293 = vmatmul.mubr.msk.bf16.vlgmr.msra.gmra.mrb[12].mxu0 %vm209_vm4, %v543_v42 }
 0x1c2   :  { %1265 = vmatpush3.bf16.msra.mxu1 %v1664_v21  ;;  %1305 = vmatpush3.bf16.msra.mxu0 %v1664_v21 }
 0x1c3   :  { %1266 = vmatprep.subr.bf16.mxu1 %v1556_v1  ;;  %1306 = vmatprep.subr.bf16.mxu0 %v1556_v1 }
 0x1c4   :  { %1268 = vmatprep.mubr.msk.bf16.mxu1 %vm1555_vm0, %v1556_v1  ;;  %1308 = vmatprep.mubr.msk.bf16.mxu0 %vm1555_vm0, %v1556_v1 }
 0x1c6   :  { %1267 = vmatpush3.bf16.msra.mxu1 %v1668_v22  ;;  %1307 = vmatpush3.bf16.msra.mxu0 %v1668_v22 }
 0x1c7   :  { %1280 = vmatprep.subr.bf16.mxu1 %v1556_v1  ;;  %1320 = vmatprep.subr.bf16.mxu0 %v1556_v1 }
 0x1c9   :  { %1269 = vmatmul.mubr.msk.bf16.vlgmr.msra.gmra.mrb[12].mxu1 %vm209_vm4, %v399_v46  ;;  %1309 = vmatmul.mubr.msk.bf16.vlgmr.msra.gmra.mrb[16].mxu0 %vm209_vm4, %v649_v47 }
 0x1ca   :  { %1281 = vmatpush3.bf16.msra.mxu1 %v1664_v21  ;;  %1321 = vmatpush3.bf16.msra.mxu0 %v1664_v21 }
 0x1cb   :  { %1282 = vmatprep.subr.bf16.mxu1 %v1556_v1  ;;  %1322 = vmatprep.subr.bf16.mxu0 %v1556_v1 }
 0x1cc   :  { %1284 = vmatprep.mubr.msk.bf16.mxu1 %vm1555_vm0, %v1556_v1  ;;  %1324 = vmatprep.mubr.msk.bf16.mxu0 %vm1555_vm0, %v1556_v1 }
 0x1ce   :  { %1283 = vmatpush3.bf16.msra.mxu1 %v1668_v22  ;;  %1323 = vmatpush3.bf16.msra.mxu0 %v1668_v22 }
 0x1cf   :  { %1296 = vmatprep.subr.bf16.mxu1 %v1556_v1  ;;  %1336 = vmatprep.subr.bf16.mxu0 %v1556_v1 }
 0x1d1   :  { %1285 = vmatmul.mubr.msk.bf16.vlgmr.msra.gmra.mrb[16].mxu1 %vm209_vm4, %v495_v50  ;;  %1325 = vmatmul.mubr.msk.bf16.vlgmr.msra.gmra.mrb[20].mxu0 %vm209_vm4, %v753_v51 }
 0x1d2   :  { %1297 = vmatpush3.bf16.msra.mxu1 %v1664_v21  ;;  %1337 = vmatpush3.bf16.msra.mxu0 %v1664_v21 }
 0x1d3   :  { %1298 = vmatprep.subr.bf16.mxu1 %v1556_v1  ;;  %1338 = vmatprep.subr.bf16.mxu0 %v1556_v1 }
 0x1d4   :  { %1300 = vmatprep.mubr.msk.bf16.mxu1 %vm1555_vm0, %v1556_v1  ;;  %1340 = vmatprep.mubr.msk.bf16.mxu0 %vm1555_vm0, %v1556_v1 }
 0x1d6   :  { %1299 = vmatpush3.bf16.msra.mxu1 %v1668_v22  ;;  %1339 = vmatpush3.bf16.msra.mxu0 %v1668_v22 }
 0x1d7   :  { %1312 = vmatprep.subr.bf16.mxu1 %v1556_v1  ;;  %1352 = vmatprep.subr.bf16.mxu0 %v1556_v1 }
 0x1d9   :  { %1301 = vmatmul.mubr.msk.bf16.vlgmr.msra.gmra.mrb[20].mxu1 %vm209_vm4, %v597_v54  ;;  %1341 = vmatmul.mubr.msk.bf16.vlgmr.msra.gmra.mrb[24].mxu0 %vm209_vm4, %v857_v55 }
 0x1da   :  { %1313 = vmatpush3.bf16.msra.mxu1 %v1664_v21  ;;  %1353 = vmatpush3.bf16.msra.mxu0 %v1664_v21 }
 0x1db   :  { %1314 = vmatprep.subr.bf16.mxu1 %v1556_v1  ;;  %1354 = vmatprep.subr.bf16.mxu0 %v1556_v1 }
 0x1dc   :  { %1316 = vmatprep.mubr.msk.bf16.mxu1 %vm1555_vm0, %v1556_v1  ;;  %1356 = vmatprep.mubr.msk.bf16.mxu0 %vm1555_vm0, %v1556_v1 }
 0x1de   :  { %1315 = vmatpush3.bf16.msra.mxu1 %v1668_v22  ;;  %1355 = vmatpush3.bf16.msra.mxu0 %v1668_v22 }
 0x1df   :  { %1328 = vmatprep.subr.bf16.mxu1 %v1556_v1 }
 0x1e1   :  { %1317 = vmatmul.mubr.msk.bf16.vlgmr.msra.gmra.mrb[24].mxu1 %vm209_vm4, %v701_v58  ;;  %1357 = vmatmul.mubr.msk.bf16.vlgmr.msra.gmra.mrb[28].mxu0 %vm209_vm4, %v961_v59 }
 0x1e2   :  { %1329 = vmatpush3.bf16.msra.mxu1 %v1664_v21  ;;  %1332 = vmatprep.mubr.msk.bf16.mxu1 %vm1555_vm0, %v1556_v1 }
 0x1e3   :  { %1330 = vmatprep.subr.bf16.mxu1 %v1556_v1 }
 0x1e6   :  { %1331 = vmatpush3.bf16.msra.mxu1 %v1668_v22 }
 0x1e7   :  { %1344 = vmatprep.subr.bf16.mxu1 %v1556_v1 }
 0x1e9   :  { %1333 = vmatmul.mubr.msk.bf16.vlgmr.msra.gmra.mrb[28].mxu1 %vm209_vm4, %v805_v61 }
 0x1ea   :  { %1345 = vmatpush3.bf16.msra.mxu1 %v1664_v21  ;;  %1348 = vmatprep.mubr.msk.bf16.mxu1 %vm1555_vm0, %v1556_v1 }
 0x1eb   :  { %1346 = vmatprep.subr.bf16.mxu1 %v1556_v1 }
 0x1ee   :  { %1347 = vmatpush3.bf16.msra.mxu1 %v1668_v22 }
 0x1ef   :  { %1389 = vmatprep.subr.bf16.mxu1 %v1554_v0 }
 0x1f1   :  { %1349 = vmatmul.mubr.msk.bf16.vlgmr.msra.gmra.mrb[32].mxu1 %vm209_vm4, %v909_v63 }
 0x1f2   :  { %1368 = vmatprep.mubr.msk.f32.mxu1 %vm1555_vm0, %v1556_v1  ;;  %1391 = vmatpush3.bf16.msra.mxu1 %v1390_v4 }
 0x1f3   :  { %1392 = vmatprep.subr.bf16.mxu1 %v1554_v0 }
 0x1f6   :  { %1394 = vmatpush3.bf16.msra.mxu1 %v1393_v7 }
 0x284   :  { %v247_v8 = vpop.f32.mrb[0].mxu1  ;;  %v389_v9 = vpop.f32.mrb[4].mxu0 }
 0x285   :  { %v1238_v10 = vpop.f32.mrb[1].mxu1  ;;  %v1262_v11 = vpop.f32.mrb[5].mxu0  ;;  %v641_v61 = vmul.f32 %v247_v8, %v1679_v25  ;;  %v797_v2 = vmul.f32 %v389_v9, %v1679_v25 }
 0x286   :  { %v250_v12 = vpop.f32.mrb[2].mxu1  ;;  %v392_v13 = vpop.f32.mrb[6].mxu0 }
 0x287   :  { %v1239_v14 = vpop.f32.mrb[3].mxu1  ;;  %v1263_v15 = vpop.f32.mrb[7].mxu0 }
 0x28c   :  { %v293_v16 = vpop.f32.mrb[4].mxu1  ;;  %v485_v1 = vpop.f32.mrb[8].mxu0 }
 0x28d   :  { %v299_v17 = vmax.f32 %v247_v8, %v293_v16  ;;  %v300_v18 = vmin.f32 %v247_v8, %v293_v16  ;;  %v1246_v19 = vpop.f32.mrb[5].mxu1  ;;  %v1278_v20 = vpop.f32.mrb[9].mxu0  ;;  %v693_v3 = vmul.f32 %v293_v16, %v1679_v25  ;;  %v901_v4 = vmul.f32 %v485_v1, %v1679_v25 }
 0x28e   :  { %v296_v21 = vpop.f32.mrb[6].mxu1  ;;  %v488_v0 = vpop.f32.mrb[10].mxu0 }
 0x28f   :  { %v1247_v22 = vpop.f32.mrb[7].mxu1  ;;  %v1279_v23 = vpop.f32.mrb[11].mxu0 }
 0x294   :  { %v341_v24 = vpop.f32.mrb[8].mxu1  ;;  %v581_v26 = vpop.f32.mrb[12].mxu0 }
 0x295   :  { %v347_v27 = vmax.f32 %v299_v17, %v341_v24  ;;  %v348_v28 = vmin.f32 %v300_v18, %v341_v24  ;;  %v1254_v29 = vpop.f32.mrb[9].mxu1  ;;  %v1294_v30 = vpop.f32.mrb[13].mxu0  ;;  %v745_v6 = vmul.f32 %v341_v24, %v1679_v25  ;;  %v1005_v7 = vmul.f32 %v581_v26, %v1679_v25 }
 0x296   :  { %v344_v31 = vpop.f32.mrb[10].mxu1  ;;  %v584_v32 = vpop.f32.mrb[14].mxu0 }
 0x297   :  { %v1255_v33 = vpop.f32.mrb[11].mxu1  ;;  %v1295_v34 = vpop.f32.mrb[15].mxu0  ;;  %v395_v35 = vmax.f32 %v347_v27, %v389_v9  ;;  %v396_v36 = vmin.f32 %v348_v28, %v389_v9 }
 0x29c   :  { %v437_v37 = vpop.f32.mrb[12].mxu1  ;;  %v1848_v38 = vpop.f32.mrb[16].mxu0 }
 0x29d   :  { %v443_v39 = vmax.f32 %v395_v35, %v437_v37  ;;  %v444_v40 = vmin.f32 %v396_v36, %v437_v37  ;;  %v1270_v41 = vpop.f32.mrb[13].mxu1  ;;  %v1310_v42 = vpop.f32.mrb[17].mxu0  ;;  %v849_v8 = vmul.f32 %v437_v37, %v1679_v25 }
 0x29e   :  { %v440_v43 = vpop.f32.mrb[14].mxu1  ;;  %v690_v44 = vpop.f32.mrb[18].mxu0 }
 0x29f   :  { %v1271_v45 = vpop.f32.mrb[15].mxu1  ;;  %v1311_v46 = vpop.f32.mrb[19].mxu0  ;;  %v491_v47 = vmax.f32 %v443_v39, %v485_v1  ;;  %v492_v48 = vmin.f32 %v444_v40, %v485_v1 }
 0x2a4   :  { %v533_v49 = vpop.f32.mrb[16].mxu1  ;;  %v1850_v50 = vpop.f32.mrb[20].mxu0 }
 0x2a5   :  { %v539_v51 = vmax.f32 %v491_v47, %v533_v49  ;;  %v540_v52 = vmin.f32 %v492_v48, %v533_v49  ;;  %v1286_v53 = vpop.f32.mrb[17].mxu1  ;;  %v1326_v54 = vpop.f32.mrb[21].mxu0  ;;  %v953_v5 = vmul.f32 %v533_v49, %v1679_v25 }
 0x2a6   :  { %v536_v55 = vpop.f32.mrb[18].mxu1  ;;  %v794_v56 = vpop.f32.mrb[22].mxu0 }
 0x2a7   :  { %v587_v57 = vmax.f32 %v539_v51, %v581_v26  ;;  %v588_v58 = vmin.f32 %v540_v52, %v581_v26  ;;  %v1287_v59 = vpop.f32.mrb[19].mxu1  ;;  %v1327_v60 = vpop.f32.mrb[23].mxu0 }
 0x2a9   :  { %v590_v62 = vmul.f32 %v587_v57, %v1679_v25  ;;  %v591_v63 = vmul.f32 %v588_v58, %v1679_v25 }
 0x2ab   :  { %v592_v10 = vsel %vm589_vm11, %v590_v62, %v591_v63 }
 0x2ac   :  { %v954_v11 = vsub.f32 %v953_v5, %v592_v10  ;;  %v798_v12 = vsub.f32 %v797_v2, %v592_v10  ;;  %v635_v13 = vpop.f32.mrb[20].mxu1  ;;  %v642_v14 = vsub.f32 %v641_v61, %v592_v10  ;;  %v694_v15 = vsub.f32 %v693_v3, %v592_v10  ;;  %v895_v17 = vpop.f32.mrb[24].mxu0 }
 0x2ad   :  { %v902_v9 = vsub.f32 %v901_v4, %v592_v10  ;;  %v1302_v18 = vpop.f32.mrb[21].mxu1  ;;  %v1342_v16 = vpop.f32.mrb[25].mxu0  ;;  %v746_v19 = vsub.f32 %v745_v6, %v592_v10  ;;  %v1006_v1 = vsub.f32 %v1005_v7, %v592_v10  ;;  %v850_v20 = vsub.f32 %v849_v8, %v592_v10 }
 0x2ae   :  { %v799_v21 = vmul.f32 1.442695, %v798_v12  ;;  %v643_v0 = vmul.f32 1.442695, %v642_v14  ;;  %v695_v22 = vmul.f32 1.442695, %v694_v15 }
 0x2af   :  { %v638_v23 = vpop.f32.mrb[22].mxu1  ;;  %v898_v24 = vpop.f32.mrb[26].mxu0  ;;  %v903_v26 = vmul.f32 1.442695, %v902_v9  ;;  %v747_v28 = vmul.f32 1.442695, %v746_v19 }
 0x2b0   :  { %v1303_v25 = vpop.f32.mrb[23].mxu1  ;;  %v1343_v27 = vpop.f32.mrb[27].mxu0  ;;  %1410 = vpow2.f32 %v799_v21  ;;  %v1007_v29 = vmul.f32 1.442695, %v1006_v1  ;;  %v851_v30 = vmul.f32 1.442695, %v850_v20 }
 0x2b1   :  { %1412 = vpow2.f32 %v643_v0  ;;  %v955_v35 = vmul.f32 1.442695, %v954_v11  ;;  %v1137_v16 = vld [vmem:[%s1886_s5] ss:$0 sm:$0xff] }
 0x2b2   :  { %1414 = vpow2.f32 %v695_v22 }
 0x2b3   :  { %1416 = vpow2.f32 %v903_v26 }
 0x2b4   :  { %v739_v31 = vpop.f32.mrb[24].mxu1  ;;  %v999_v32 = vpop.f32.mrb[28].mxu0  ;;  %1418 = vpow2.f32 %v747_v28 }
 0x2b5   :  { %v1318_v33 = vpop.f32.mrb[25].mxu1  ;;  %v1358_v34 = vpop.f32.mrb[29].mxu0  ;;  %1420 = vpow2.f32 %v1007_v29 }
 0x2b6   :  { %v742_v36 = vpop.f32.mrb[26].mxu1  ;;  %v1002_v37 = vpop.f32.mrb[30].mxu0  ;;  %1422 = vpow2.f32 %v851_v30 }
 0x2b7   :  { %v1319_v39 = vpop.f32.mrb[27].mxu1  ;;  %v1359_v40 = vpop.f32.mrb[31].mxu0  ;;  %1424 = vpow2.f32 %v955_v35 }
 0x2ba   :  { %v1411_v41 = vpop.eup %1410 }
 0x2bb   :  { %v1413_v42 = vpop.eup %1412  ;;  %v802_v43 = vmul.f32 %v1411_v41, %v1850_v50 }
 0x2bc   :  { %v843_v44 = vpop.f32.mrb[28].mxu1  ;;  %v1415_v45 = vpop.eup %1414  ;;  %v646_v46 = vmul.f32 %v1413_v42, %v635_v13 }
 0x2bd   :  { %v1334_v47 = vpop.f32.mrb[29].mxu1  ;;  %v1417_v48 = vpop.eup %1416  ;;  %v697_v49 = vadd.f32 %v1415_v45, %v1413_v42  ;;  %v698_v51 = vmul.f32 %v1415_v45, %v1848_v38 }
 0x2be   :  { %v846_v52 = vpop.f32.mrb[30].mxu1  ;;  %v1419_v53 = vpop.eup %1418  ;;  %v906_v54 = vmul.f32 %v1417_v48, %v895_v17 }
 0x2bf   :  { %v1335_v55 = vpop.f32.mrb[31].mxu1  ;;  %v1421_v56 = vpop.eup %1420  ;;  %v699_v57 = vadd.f32 %v698_v51, %v646_v46  ;;  %v749_v58 = vadd.f32 %v1419_v53, %v697_v49  ;;  %v750_v59 = vmul.f32 %v1419_v53, %v739_v31 }
 0x2c0   :  { %v1423_v60 = vpop.eup %1422  ;;  %v1010_v61 = vmul.f32 %v1421_v56, %v999_v32 }
 0x2c1   :  { %v751_v62 = vadd.f32 %v750_v59, %v699_v57  ;;  %v801_v50 = vadd.f32 %v1411_v41, %v749_v58  ;;  %v854_v63 = vmul.f32 %v1423_v60, %v843_v44  ;;  %v1425_v2 = vpop.eup %1424 }
 0x2c3   :  { %v803_v3 = vadd.f32 %v802_v43, %v751_v62  ;;  %v853_v4 = vadd.f32 %v1423_v60, %v801_v50 }
 0x2c4   :  { %v947_v5 = vpop.f32.mrb[32].mxu1 }
 0x2c5   :  { %v958_v6 = vmul.f32 %v1425_v2, %v947_v5  ;;  %v1350_v7 = vpop.f32.mrb[33].mxu1  ;;  %v855_v38 = vadd.f32 %v854_v63, %v803_v3  ;;  %v905_v8 = vadd.f32 %v1417_v48, %v853_v4 }
 0x2c6   :  { %v950_v10 = vpop.f32.mrb[34].mxu1 }
 0x2c7   :  { %v1351_v11 = vpop.f32.mrb[35].mxu1  ;;  %v907_v12 = vadd.f32 %v906_v54, %v855_v38  ;;  %v957_v13 = vadd.f32 %v1425_v2, %v905_v8 }
 0x2c9   :  { %v959_v14 = vadd.f32 %v958_v6, %v907_v12  ;;  %v1009_v15 = vadd.f32 %v1421_v56, %v957_v13 }
 0x2cb   :  { %v1011_v17 = vadd.f32 %v1010_v61, %v959_v14  ;;  %1426 = vrcp.f32 %v1009_v15 }
 0x2d5   :  { %v1427_v9 = vpop.eup %1426 }
 0x2d6   :  { %v1013_v18 = vmul.f32 %v1427_v9, %v1011_v17 }
 0x2d8   :  { %1369 = vmatmul.mubr.msk.f32.vlgmr.msra.gmra.mrb[36].mxu1 %vm209_vm4, %v1013_v18 }
 0x3ab   :  { %v1094_v19 = vpop.f32.mrb[36].mxu1 }
 0x3ac   :  { %v1095_v1 = vadd.f32 %v1137_v16, %v1094_v19  ;;  %v1370_v20 = vpop.f32.mrb[37].mxu1 }
 0x3ae   :  { %1099 = vst.msk [vmem:[#allocation10] sm:$0xf] %vm1098_vm12, %v1095_v1 }
 0x3af   :  { %1527 = shalt.err (!%p1524_p8)
}
 0x3b0   :  { %s1528_s29 = scalar_lea.hbm %s1887_s6, 64 }
 0x3b1   :  { %p1529_p9 = scmp.ne.s32.totalorder %s1887_s6, %s1528_s29  ;;  %p1532_p10 = scmp.lt.u32.totalorder %s1528_s29, %s1887_s6 }
 0x3b3   :  { %p1534_p11 = pnand %p1532_p10, %p1529_p9 }
 0x3b5   :  { %1537 = shalt.err (!%p1534_p11)
}
 0x3b6   :  { %1109 = dma.vmem_to_hbm [thread:$0]  %s1107_s25, 64, %s1887_s6, [#allocation4]  }
 0x3b7   :  { %1544 = dma.done.wait [#allocation4], 64  }
 0x3b8   :  { %1545 = vsyncadd [#allocation4], 4294967232 }
 0x3b9   :  { %1113 = vsyncpa [#allocation3], 1 }
 0x3ba   :  { %1114 = vsyncpa [#allocation6], 1 }
 0x3bb   :  { %1115 = vsyncpa [#allocation9], 1 }
 0x3bc   :  { %1116 = vsyncpa [#allocation4], 1 }

</bundles_post_ra>
